<compile_context>
chip_gen: v5e
topology: v5e:2x2
jax: 0.10.0
libtpu: 0.0.40
codegen_flags: <defaults>
</compile_context>

<pallas_src>
import functools

import jax
import jax.numpy as jnp
from jax.experimental import pallas as pl
from jax.experimental.pallas import tpu as pltpu

HIDDEN1 = 1000
HIDDEN2 = 500

_LANE = 128
_SUBLANE_BF16 = 16  # bf16 packs 16 rows per vreg sublane group


def _round_up(x, m):
    return ((x + m - 1) // m) * m


def _pad2d(a, rows, cols):
    r, c = a.shape
    return jnp.pad(a, ((0, rows - r), (0, cols - c)))


def _mlp_kernel(x_ref, w1_ref, b1_ref, w2_ref, b2_ref, w3_ref, b3_ref, o_ref):
    """One row-tile of the 3-layer MLP. Weights resident in VMEM (constant index_map)."""
    x = x_ref[...]                                                     # (tm, K1) bf16
    h1 = jnp.dot(x, w1_ref[...], preferred_element_type=jnp.float32)   # MXU, f32 acc
    # bias + ReLU + bf16 cast fused: intermediate lives in bf16 (halves vst traffic)
    h1 = jnp.maximum(h1 + b1_ref[...], 0.0).astype(w2_ref.dtype)
    # dropout(p=0.5, training=False) -> identity (inference path)
    h2 = jnp.dot(h1, w2_ref[...], preferred_element_type=jnp.float32)
    h2 = jnp.maximum(h2 + b2_ref[...], 0.0).astype(w3_ref.dtype)
    # dropout(p=0.5, training=False) -> identity (inference path)
    out = jnp.dot(h2, w3_ref[...], preferred_element_type=jnp.float32) + b3_ref[...]
    o_ref[...] = out.astype(o_ref.dtype)                               # bf16 writeback


def prepare_params(params, compute_dtype=jnp.bfloat16):
    """Pad feature dims to 128-lane multiples and cast weights to bf16 ONCE
    (hoisted out of the per-call path). Biases stay f32 (zero-padded lanes)."""
    in_features = params["w1"].shape[0]
    out_features = params["w3"].shape[1]
    k1 = _round_up(in_features, _LANE)
    h1p = _round_up(HIDDEN1, _LANE)      # 1024
    h2p = _round_up(HIDDEN2, _LANE)      # 512
    op = _round_up(out_features, _LANE)
    return {
        "w1": _pad2d(params["w1"], k1, h1p).astype(compute_dtype),
        "b1": _pad2d(params["b1"], 1, h1p),
        "w2": _pad2d(params["w2"], h1p, h2p).astype(compute_dtype),
        "b2": _pad2d(params["b2"], 1, h2p),
        "w3": _pad2d(params["w3"], h2p, op).astype(compute_dtype),
        "b3": _pad2d(params["b3"], 1, op),
    }


def argument_classify_forward(x, prepared, out_features, *, block_rows=512):
    """x: (N, in_features) f32.  prepared: output of prepare_params.
    out_features: static int (real, unpadded output width).  Returns (N, out_features) f32."""
    n, _ = x.shape
    w1, b1 = prepared["w1"], prepared["b1"]
    w2, b2 = prepared["w2"], prepared["b2"]
    w3, b3 = prepared["w3"], prepared["b3"]
    k1, h1p = w1.shape
    h2p = w2.shape[1]
    op = w3.shape[1]
    compute_dtype = w1.dtype

    # ---- Row-tile selection --------------------------------------------------
    # Only the (16,128) bf16 block constraint applies to M (not a 256 multiple):
    # small N uses exactly round_up(n, 16) rows; large N uses block_rows (default
    # 512, a multiple of 256 -> clean full-width MXU passes on v6e/v7x).
    block_rows = max(_SUBLANE_BF16, _round_up(int(block_rows), _SUBLANE_BF16))
    n16 = _round_up(n, _SUBLANE_BF16)
    tm = min(block_rows, n16)
    # v7x megacore: prefer >=2 grid steps (2 TensorCores) whenever the rows can be
    # split into two >=16-row tiles; otherwise fall back to a single step.
    if tm >= 2 * _SUBLANE_BF16 and _round_up(n16, tm) // tm < 2:
        tm = _round_up(pl.cdiv(n16, 2), _SUBLANE_BF16)
    n_pad = _round_up(n, tm)
    grid = (n_pad // tm,)

    # Per-call work on x only (weights were padded/cast once in prepare_params).
    x_p = _pad2d(x, n_pad, k1).astype(compute_dtype)

    in_specs = [
        pl.BlockSpec((tm, k1), lambda i: (i, 0)),
        # Constant index_maps -> weights/biases stay resident across grid steps.
        pl.BlockSpec((k1, h1p), lambda i: (0, 0)),
        pl.BlockSpec((1, h1p), lambda i: (0, 0)),
        pl.BlockSpec((h1p, h2p), lambda i: (0, 0)),
        pl.BlockSpec((1, h2p), lambda i: (0, 0)),
        pl.BlockSpec((h2p, op), lambda i: (0, 0)),
        pl.BlockSpec((1, op), lambda i: (0, 0)),
    ]
    out_specs = pl.BlockSpec((tm, op), lambda i: (i, 0))

    flops = 2 * n_pad * (k1 * h1p + h1p * h2p + h2p * op)
    bytes_accessed = (2 * (n_pad * k1 + k1 * h1p + h1p * h2p + h2p * op + n_pad * op)
                      + 4 * (h1p + h2p + op))

    out_padded = pl.pallas_call(
        _mlp_kernel,
        out_shape=jax.ShapeDtypeStruct((n_pad, op), compute_dtype),   # bf16 output
        grid_spec=pltpu.PrefetchScalarGridSpec(
            num_scalar_prefetch=0,
            grid=grid,
            in_specs=in_specs,
            out_specs=out_specs,
        ),
        compiler_params=pltpu.CompilerParams(
            dimension_semantics=("parallel",),
            vmem_limit_bytes=32 * 1024 * 1024,   # headroom; footprint ~6 MiB, safe on v5e/v6e/v7x
        ),
        cost_estimate=pl.CostEstimate(
            flops=flops, transcendentals=0, bytes_accessed=bytes_accessed),
    )(x_p, w1, b1, w2, b2, w3, b3)

    # Slice away N / feature padding; return f32 like the PyTorch module.
    return out_padded[:n, :out_features].astype(jnp.float32)


def init_params(key, in_features, out_features):
    """Deterministic synthetic parameters. Stored as (in, out) / (1, out), float32."""
    k1, k2, k3, k4, k5, k6 = jax.random.split(key, 6)
    s1 = 1.0 / jnp.sqrt(in_features)
    s2 = 1.0 / jnp.sqrt(HIDDEN1)
    s3 = 1.0 / jnp.sqrt(HIDDEN2)
    return {
        "w1": jax.random.uniform(k1, (in_features, HIDDEN1), jnp.float32, -s1, s1),
        "b1": jax.random.uniform(k2, (1, HIDDEN1), jnp.float32, -s1, s1),
        "w2": jax.random.uniform(k3, (HIDDEN1, HIDDEN2), jnp.float32, -s2, s2),
        "b2": jax.random.uniform(k4, (1, HIDDEN2), jnp.float32, -s2, s2),
        "w3": jax.random.uniform(k5, (HIDDEN2, out_features), jnp.float32, -s3, s3),
        "b3": jax.random.uniform(k6, (1, out_features), jnp.float32, -s3, s3),
    }


def reference_forward(x, params, compute_dtype=jnp.bfloat16):
    """Mirrors the kernel's bf16-input / f32-accumulate matmul path."""
    def mm(a, w):
        return jnp.dot(a.astype(compute_dtype).astype(jnp.float32),
                       w.astype(compute_dtype).astype(jnp.float32))
    h1 = jnp.maximum(mm(x, params["w1"]) + params["b1"], 0.0)
    h2 = jnp.maximum(mm(h1, params["w2"]) + params["b2"], 0.0)
    return mm(h2, params["w3"]) + params["b3"]


if __name__ == "__main__":
    batch, seq, in_features, out_features = 2, 8, 32, 16

    key = jax.random.PRNGKey(0)
    kx, kp = jax.random.split(key)
    # word_rep_seqs: (batch, seq, in_features)
    word_rep_seqs = jax.random.normal(kx, (batch, seq, in_features), jnp.float32)
    params = init_params(kp, in_features, out_features)

    # Pad + cast the weights exactly once (hoisted out of the per-call path).
    prepared = prepare_params(params)

    # Linear applies over the last dim -> flatten leading dims.
    x2d = word_rep_seqs.reshape(batch * seq, in_features)

    fwd = jax.jit(functools.partial(argument_classify_forward,
                                    out_features=out_features))
    out2d = fwd(x2d, prepared)
    out = out2d.reshape(batch, seq, out_features)
    jax.block_until_ready(out)

    ref = reference_forward(x2d, params).reshape(batch, seq, out_features)
    assert out.shape == (batch, seq, out_features)
    assert jnp.allclose(out, ref, atol=1e-2, rtol=1e-2), "mismatch vs reference"

    # TODO(synk): training-mode dropout (p=0.5) not implemented; inference path only.
    print("KERNEL_OK")
</pallas_src>

<mosaic_0001>
module attributes {stable_mosaic.version = 11 : i64} {
  func.func @_mlp_kernel(%arg0: i32, %arg1: memref<16x128xbf16, #tpu.memory_space<vmem>>, %arg2: memref<128x1024xbf16, #tpu.memory_space<vmem>>, %arg3: memref<1x1024xf32, #tpu.memory_space<vmem>>, %arg4: memref<1024x512xbf16, #tpu.memory_space<vmem>>, %arg5: memref<1x512xf32, #tpu.memory_space<vmem>>, %arg6: memref<512x128xbf16, #tpu.memory_space<vmem>>, %arg7: memref<1x128xf32, #tpu.memory_space<vmem>>, %arg8: memref<16x128xbf16, #tpu.memory_space<vmem>>) attributes {dimension_semantics = [#tpu.dimension_semantics<parallel>], iteration_bounds = array<i64: 1>, scalar_prefetch = 0 : i64, scratch_operands = 0 : i64, tpu.core_type = #tpu.core_type<tc>, window_params = [{transform_indices = @transform_0, window_bounds = array<i64: 16, 128>}, {pipeline_mode = #tpu.pipeline_mode<synchronous>, transform_indices = @transform_1, window_bounds = array<i64: 128, 1024>}, {pipeline_mode = #tpu.pipeline_mode<synchronous>, transform_indices = @transform_2, window_bounds = array<i64: 1, 1024>}, {pipeline_mode = #tpu.pipeline_mode<synchronous>, transform_indices = @transform_3, window_bounds = array<i64: 1024, 512>}, {pipeline_mode = #tpu.pipeline_mode<synchronous>, transform_indices = @transform_4, window_bounds = array<i64: 1, 512>}, {pipeline_mode = #tpu.pipeline_mode<synchronous>, transform_indices = @transform_5, window_bounds = array<i64: 512, 128>}, {pipeline_mode = #tpu.pipeline_mode<synchronous>, transform_indices = @transform_6, window_bounds = array<i64: 1, 128>}, {transform_indices = @transform_7, window_bounds = array<i64: 16, 128>}]} {
    %c0 = arith.constant 0 : index
    %c0_0 = arith.constant 0 : index
    %0 = vector.load %arg1[%c0, %c0_0] : memref<16x128xbf16, #tpu.memory_space<vmem>>, vector<16x128xbf16>
    %c0_1 = arith.constant 0 : index
    %c0_2 = arith.constant 0 : index
    %1 = vector.load %arg2[%c0_1, %c0_2] : memref<128x1024xbf16, #tpu.memory_space<vmem>>, vector<128x1024xbf16>
    %cst = arith.constant dense<0.000000e+00> : vector<16x1024xf32>
    %2 = tpu.matmul %0, %1, %cst {dimension_numbers = #tpu.dot_dimension_numbers<[1], [0], [0], [1], [0, 0, 1, 1], [], []>} : vector<16x128xbf16>, vector<128x1024xbf16>, vector<16x1024xf32> -> vector<16x1024xf32>
    %c0_3 = arith.constant 0 : index
    %c0_4 = arith.constant 0 : index
    %3 = vector.load %arg3[%c0_3, %c0_4] : memref<1x1024xf32, #tpu.memory_space<vmem>>, vector<1x1024xf32>
    %4 = vector.broadcast %3 : vector<1x1024xf32> to vector<16x1024xf32>
    %5 = arith.addf %2, %4 : vector<16x1024xf32>
    %cst_5 = arith.constant 0.000000e+00 : f32
    %6 = vector.broadcast %cst_5 : f32 to vector<16x1024xf32>
    %7 = arith.maximumf %5, %6 : vector<16x1024xf32>
    %8 = arith.truncf %7 : vector<16x1024xf32> to vector<16x1024xbf16>
    %c0_6 = arith.constant 0 : index
    %c0_7 = arith.constant 0 : index
    %9 = vector.load %arg4[%c0_6, %c0_7] : memref<1024x512xbf16, #tpu.memory_space<vmem>>, vector<1024x512xbf16>
    %cst_8 = arith.constant dense<0.000000e+00> : vector<16x512xf32>
    %10 = tpu.matmul %8, %9, %cst_8 {dimension_numbers = #tpu.dot_dimension_numbers<[1], [0], [0], [1], [0, 0, 1, 1], [], []>} : vector<16x1024xbf16>, vector<1024x512xbf16>, vector<16x512xf32> -> vector<16x512xf32>
    %c0_9 = arith.constant 0 : index
    %c0_10 = arith.constant 0 : index
    %11 = vector.load %arg5[%c0_9, %c0_10] : memref<1x512xf32, #tpu.memory_space<vmem>>, vector<1x512xf32>
    %12 = vector.broadcast %11 : vector<1x512xf32> to vector<16x512xf32>
    %13 = arith.addf %10, %12 : vector<16x512xf32>
    %cst_11 = arith.constant 0.000000e+00 : f32
    %14 = vector.broadcast %cst_11 : f32 to vector<16x512xf32>
    %15 = arith.maximumf %13, %14 : vector<16x512xf32>
    %16 = arith.truncf %15 : vector<16x512xf32> to vector<16x512xbf16>
    %c0_12 = arith.constant 0 : index
    %c0_13 = arith.constant 0 : index
    %17 = vector.load %arg6[%c0_12, %c0_13] : memref<512x128xbf16, #tpu.memory_space<vmem>>, vector<512x128xbf16>
    %cst_14 = arith.constant dense<0.000000e+00> : vector<16x128xf32>
    %18 = tpu.matmul %16, %17, %cst_14 {dimension_numbers = #tpu.dot_dimension_numbers<[1], [0], [0], [1], [0, 0, 1, 1], [], []>} : vector<16x512xbf16>, vector<512x128xbf16>, vector<16x128xf32> -> vector<16x128xf32>
    %c0_15 = arith.constant 0 : index
    %c0_16 = arith.constant 0 : index
    %19 = vector.load %arg7[%c0_15, %c0_16] : memref<1x128xf32, #tpu.memory_space<vmem>>, vector<1x128xf32>
    %20 = vector.broadcast %19 : vector<1x128xf32> to vector<16x128xf32>
    %21 = arith.addf %18, %20 : vector<16x128xf32>
    %22 = arith.truncf %21 : vector<16x128xf32> to vector<16x128xbf16>
    %c0_17 = arith.constant 0 : index
    %c0_18 = arith.constant 0 : index
    %23 = vector.load %arg8[%c0_17, %c0_18] : memref<16x128xbf16, #tpu.memory_space<vmem>>, vector<16x128xbf16>
    tpu.vector_store %arg8[%c0_17, %c0_18], %22 {strides = array<i32>} : memref<16x128xbf16, #tpu.memory_space<vmem>>, vector<16x128xbf16>,
    return
  }
  func.func @transform_0(%arg0: i32) -> (i32, i32) {
    %c0_i32 = arith.constant 0 : i32
    %c0_i32_0 = arith.constant 0 : i32
    return %arg0, %c0_i32 : i32, i32
  }
  func.func @transform_1(%arg0: i32) -> (i32, i32) {
    %c0_i32 = arith.constant 0 : i32
    %c0_i32_0 = arith.constant 0 : i32
    %c0_i32_1 = arith.constant 0 : i32
    return %c0_i32, %c0_i32_0 : i32, i32
  }
  func.func @transform_2(%arg0: i32) -> (i32, i32) {
    %c0_i32 = arith.constant 0 : i32
    %c0_i32_0 = arith.constant 0 : i32
    %c0_i32_1 = arith.constant 0 : i32
    return %c0_i32, %c0_i32_0 : i32, i32
  }
  func.func @transform_3(%arg0: i32) -> (i32, i32) {
    %c0_i32 = arith.constant 0 : i32
    %c0_i32_0 = arith.constant 0 : i32
    %c0_i32_1 = arith.constant 0 : i32
    return %c0_i32, %c0_i32_0 : i32, i32
  }
  func.func @transform_4(%arg0: i32) -> (i32, i32) {
    %c0_i32 = arith.constant 0 : i32
    %c0_i32_0 = arith.constant 0 : i32
    %c0_i32_1 = arith.constant 0 : i32
    return %c0_i32, %c0_i32_0 : i32, i32
  }
  func.func @transform_5(%arg0: i32) -> (i32, i32) {
    %c0_i32 = arith.constant 0 : i32
    %c0_i32_0 = arith.constant 0 : i32
    %c0_i32_1 = arith.constant 0 : i32
    return %c0_i32, %c0_i32_0 : i32, i32
  }
  func.func @transform_6(%arg0: i32) -> (i32, i32) {
    %c0_i32 = arith.constant 0 : i32
    %c0_i32_0 = arith.constant 0 : i32
    %c0_i32_1 = arith.constant 0 : i32
    return %c0_i32, %c0_i32_0 : i32, i32
  }
  func.func @transform_7(%arg0: i32) -> (i32, i32) {
    %c0_i32 = arith.constant 0 : i32
    %c0_i32_0 = arith.constant 0 : i32
    return %arg0, %c0_i32 : i32, i32
  }
}

</mosaic_0001>

<bundles_post_ra>
// kernel: argument_classify_forward.1
= control target key start
LH: loop header
LB: loop body
LE: loop exit
PB: predicated region body
PF: predicated region fallthrough
CT: control target
= control target key end

     0   :  { %12 = vsyncpa [#allocation3], 0  ;;  %s4996_s0 = inlined_call_operand.vmem [shape: bf16[16,128], index: 0, kind: input, shape index: {}]   ;;  %s4997_s1 = inlined_call_operand.hbm [shape: bf16[128,1024], index: 1, kind: input, shape index: {}]   ;;  %s4998_s2 = inlined_call_operand.vmem [shape: f32[1,1024], index: 2, kind: input, shape index: {}]   ;;  %s4999_s3 = inlined_call_operand.hbm [shape: bf16[1024,512], index: 3, kind: input, shape index: {}]   ;;  %s5000_s4 = inlined_call_operand.vmem [shape: f32[1,512], index: 4, kind: input, shape index: {}]   ;;  %s5001_s5 = inlined_call_operand.hbm [shape: bf16[512,128], index: 5, kind: input, shape index: {}]   ;;  %s5002_s6 = inlined_call_operand.vmem [shape: f32[1,128], index: 6, kind: input, shape index: {}]   ;;  %s5003_s7 = inlined_call_operand.vmem [shape: bf16[16,128], index: 7, kind: output, shape index: {}]  }
   0x1   :  { %13 = vsyncpa [#allocation5], 0  ;;  %s35_s26 = sshll.u32 %s4999_s3, 4  ;;  %s4807_s27 = smov [#allocation4]   ;;  %s36_s26 = int_to_ptr.hbm [resolvable:$true] %s35_s26 }
   0x2   :  { %s37_s28 = sshll.u32 %s4807_s27, 4  ;;  %s20_s8 = sshll.u32 %s4997_s1, 4  ;;  %s38_s28 = int_to_ptr.vmem [resolvable:$true] %s37_s28  ;;  %s21_s8 = int_to_ptr.hbm [resolvable:$true] %s20_s8 }
   0x3   :  { %s4808_s9 = smov 256   ;;  %s4809_s10 = smov 16  }
   0x4   :  { %43 = dma.hbm_to_vmem [thread:$0]  %s36_s26, 32768, %s38_s28, [#allocation5], %s4808_s9, %s4808_s9, %s4809_s10  }
   0x5   :  { %s4810_s11 = smov [#allocation2]   ;;  %s4811_s13 = smov 512  }
   0x6   :  { %s22_s12 = sshll.u32 %s4810_s11, 4  ;;  %s4812_s14 = smov 32   ;;  %s23_s12 = int_to_ptr.vmem [resolvable:$true] %s22_s12 }
   0x7   :  { %28 = dma.hbm_to_vmem [thread:$0]  %s21_s8, 8192, %s23_s12, [#allocation3], %s4811_s13, %s4811_s13, %s4812_s14  }
   0x8   :  { %s50_s16 = sshll.u32 %s5001_s5, 4  ;;  %s4813_s17 = smov [#allocation6]   ;;  %s51_s16 = int_to_ptr.hbm [resolvable:$true] %s50_s16 }
   0x9   :  { %s52_s18 = sshll.u32 %s4813_s17, 4  ;;  %s4814_s19 = smov 64   ;;  %s53_s18 = int_to_ptr.vmem [resolvable:$true] %s52_s18 }
   0xa   :  { %s4815_s1 = smov 4  }
   0xb   :  { %58 = dma.hbm_to_vmem [thread:$0]  %s51_s16, 4096, %s53_s18, [#allocation5], %s4814_s19, %s4814_s19, %s4815_s1  }
   0xc   :  { %4803 = dma.done.wait [#allocation3], 8192  }
   0xd   :  { %4804 = vsyncadd [#allocation3], 4294959104 }
   0xe   :  { %4805 = dma.done.wait [#allocation5], 36864  }
   0xf   :  { %4806 = vsyncadd [#allocation5], 4294930432  ;;  %v3181_v0 = vld [vmem:[#allocation2 + $0x1c0] sm:$0xf]  ;;  %v4420_v2 = vld [vmem:[#allocation2 + $0x1c4] sm:$0xf] }
  0x10   :  { %v4424_v1 = vld [vmem:[#allocation2 + $0x1dc] sm:$0xf0]  ;;  %v3183_v4 = vld [vmem:[#allocation2 + $0x1e0] sm:$0xf0]  ;;  %v3189_v5 = vld [vmem:[#allocation2 + $0x1c8] sm:$0xf] }
  0x11   :  { %v3182_v3 = vor.u32 %v4424_v1, %v3181_v0  ;;  %v4425_v6 = vld [vmem:[#allocation2 + $0x1e4] sm:$0xf0]  ;;  %v3186_v7 = vor.u32 %v4420_v2, %v3183_v4  ;;  %v4421_v9 = vld [vmem:[#allocation2 + $0x1cc] sm:$0xf]  ;;  %v3149_v11 = vld [vmem:[#allocation2 + $0x180] sm:$0xf] }
  0x12   :  { %v3190_v8 = vor.u32 %v4425_v6, %v3189_v5  ;;  %v3191_v10 = vld [vmem:[#allocation2 + $0x1e8] sm:$0xf0]  ;;  %v4416_v13 = vld [vmem:[#allocation2 + $0x19c] sm:$0xf0]  ;;  %v4412_v14 = vld [vmem:[#allocation2 + $0x184] sm:$0xf] }
  0x13   :  { %483 = vmatpush.bf16.msra.mxu0 %v3182_v3  ;;  %v3194_v12 = vor.u32 %v4421_v9, %v3191_v10  ;;  %v3151_v15 = vld [vmem:[#allocation2 + $0x1a0] sm:$0xf0]  ;;  %497 = vmatpush.bf16.msra.mxu1 %v3186_v7  ;;  %v3150_v16 = vor.u32 %v4416_v13, %v3149_v11  ;;  %v3157_v18 = vld [vmem:[#allocation2 + $0x188] sm:$0xf]  ;;  %v4413_v20 = vld [vmem:[#allocation2 + $0x18c] sm:$0xf] }
  0x14   :  { %511 = vmatpush.bf16.msra.mxu2 %v3190_v8  ;;  %v3154_v17 = vor.u32 %v4412_v14, %v3151_v15  ;;  %v4417_v19 = vld [vmem:[#allocation2 + $0x1a4] sm:$0xf0]  ;;  %v3159_v22 = vld [vmem:[#allocation2 + $0x1a8] sm:$0xf0]  ;;  %v3117_v23 = vld [vmem:[#allocation2 + $0x140] sm:$0xf] }
  0x15   :  { %525 = vmatpush.bf16.msra.mxu3 %v3194_v12  ;;  %v3158_v21 = vor.u32 %v4417_v19, %v3157_v18  ;;  %v4408_v24 = vld [vmem:[#allocation2 + $0x15c] sm:$0xf0]  ;;  %v3162_v25 = vor.u32 %v4413_v20, %v3159_v22  ;;  %v4404_v26 = vld [vmem:[#allocation2 + $0x144] sm:$0xf]  ;;  %v3125_v28 = vld [vmem:[#allocation2 + $0x148] sm:$0xf] }
  0x16   :  { %v3119_v27 = vld [vmem:[#allocation2 + $0x160] sm:$0xf0]  ;;  %v3118_v29 = vor.u32 %v4408_v24, %v3117_v23  ;;  %v4409_v30 = vld [vmem:[#allocation2 + $0x164] sm:$0xf0]  ;;  %v4405_v31 = vld [vmem:[#allocation2 + $0x14c] sm:$0xf] }
  0x17   :  { %484 = vmatpush.bf16.msra.mxu0 %v3150_v16  ;;  %v3127_v32 = vld [vmem:[#allocation2 + $0x168] sm:$0xf0]  ;;  %498 = vmatpush.bf16.msra.mxu1 %v3154_v17  ;;  %v3122_v33 = vor.u32 %v4404_v26, %v3119_v27  ;;  %v3126_v34 = vor.u32 %v4409_v30, %v3125_v28  ;;  %v3085_v35 = vld [vmem:[#allocation2 + $0x100] sm:$0xf]  ;;  %v4396_v37 = vld [vmem:[#allocation2 + $0x104] sm:$0xf] }
  0x18   :  { %512 = vmatpush.bf16.msra.mxu2 %v3158_v21  ;;  %v4400_v36 = vld [vmem:[#allocation2 + $0x11c] sm:$0xf0]  ;;  %v3130_v38 = vor.u32 %v4405_v31, %v3127_v32  ;;  %v3087_v39 = vld [vmem:[#allocation2 + $0x120] sm:$0xf0]  ;;  %v3093_v40 = vld [vmem:[#allocation2 + $0x108] sm:$0xf] }
  0x19   :  { %526 = vmatpush.bf16.msra.mxu3 %v3162_v25  ;;  %v4401_v41 = vld [vmem:[#allocation2 + $0x124] sm:$0xf0]  ;;  %v4397_v42 = vld [vmem:[#allocation2 + $0x10c] sm:$0xf]  ;;  %v3086_v44 = vor.u32 %v4400_v36, %v3085_v35  ;;  %v3090_v45 = vor.u32 %v4396_v37, %v3087_v39  ;;  %v3053_v47 = vld [vmem:[#allocation2 + $0xc0] sm:$0xf] }
  0x1a   :  { %v3095_v43 = vld [vmem:[#allocation2 + $0x128] sm:$0xf0]  ;;  %v3094_v46 = vor.u32 %v4401_v41, %v3093_v40  ;;  %v4392_v48 = vld [vmem:[#allocation2 + $0xdc] sm:$0xf0]  ;;  %v4388_v49 = vld [vmem:[#allocation2 + $0xc4] sm:$0xf] }
  0x1b   :  { %485 = vmatpush.bf16.msra.mxu0 %v3118_v29  ;;  %499 = vmatpush.bf16.msra.mxu1 %v3122_v33  ;;  %v3098_v50 = vor.u32 %v4397_v42, %v3095_v43  ;;  %v3055_v51 = vld [vmem:[#allocation2 + $0xe0] sm:$0xf0]  ;;  %v3061_v52 = vld [vmem:[#allocation2 + $0xc8] sm:$0xf]  ;;  %v4389_v54 = vld [vmem:[#allocation2 + $0xcc] sm:$0xf]  ;;  %v3054_v56 = vor.u32 %v4392_v48, %v3053_v47 }
  0x1c   :  { %513 = vmatpush.bf16.msra.mxu2 %v3126_v34  ;;  %v4393_v53 = vld [vmem:[#allocation2 + $0xe4] sm:$0xf0]  ;;  %v3063_v55 = vld [vmem:[#allocation2 + $0xe8] sm:$0xf0]  ;;  %v3058_v57 = vor.u32 %v4388_v49, %v3055_v51  ;;  %v3021_v59 = vld [vmem:[#allocation2 + $0x80] sm:$0xf] }
  0x1d   :  { %527 = vmatpush.bf16.msra.mxu3 %v3130_v38  ;;  %v3062_v58 = vor.u32 %v4393_v53, %v3061_v52  ;;  %v4384_v60 = vld [vmem:[#allocation2 + $0x9c] sm:$0xf0]  ;;  %v4380_v61 = vld [vmem:[#allocation2 + $0x84] sm:$0xf]  ;;  %v3066_v62 = vor.u32 %v4389_v54, %v3063_v55  ;;  %v3029_v0 = vld [vmem:[#allocation2 + $0x88] sm:$0xf] }
  0x1e   :  { %v3023_v63 = vld [vmem:[#allocation2 + $0xa0] sm:$0xf0]  ;;  %v4385_v1 = vld [vmem:[#allocation2 + $0xa4] sm:$0xf0]  ;;  %v4381_v2 = vld [vmem:[#allocation2 + $0x8c] sm:$0xf]  ;;  %v3022_v4 = vor.u32 %v4384_v60, %v3021_v59 }
  0x1f   :  { %486 = vmatpush.bf16.msra.mxu0 %v3086_v44  ;;  %500 = vmatpush.bf16.msra.mxu1 %v3090_v45  ;;  %v3031_v3 = vld [vmem:[#allocation2 + $0xa8] sm:$0xf0]  ;;  %v3026_v5 = vor.u32 %v4380_v61, %v3023_v63  ;;  %v3030_v6 = vor.u32 %v4385_v1, %v3029_v0  ;;  %v2989_v7 = vld [vmem:[#allocation2 + $0x40] sm:$0xf]  ;;  %v4372_v9 = vld [vmem:[#allocation2 + $0x44] sm:$0xf] }
  0x20   :  { %514 = vmatpush.bf16.msra.mxu2 %v3094_v46  ;;  %v4376_v8 = vld [vmem:[#allocation2 + $0x5c] sm:$0xf0]  ;;  %v3034_v10 = vor.u32 %v4381_v2, %v3031_v3  ;;  %v2991_v11 = vld [vmem:[#allocation2 + $0x60] sm:$0xf0]  ;;  %v2997_v12 = vld [vmem:[#allocation2 + $0x48] sm:$0xf] }
  0x21   :  { %528 = vmatpush.bf16.msra.mxu3 %v3098_v50  ;;  %v4377_v13 = vld [vmem:[#allocation2 + $0x64] sm:$0xf0]  ;;  %v4373_v14 = vld [vmem:[#allocation2 + $0x4c] sm:$0xf]  ;;  %v2990_v16 = vor.u32 %v4376_v8, %v2989_v7  ;;  %v2957_v17 = vld [vmem:[#allocation2] sm:$0xf]  ;;  %v2994_v19 = vor.u32 %v4372_v9, %v2991_v11 }
  0x22   :  { %v2999_v15 = vld [vmem:[#allocation2 + $0x68] sm:$0xf0]  ;;  %v4368_v18 = vld [vmem:[#allocation2 + $0x1c] sm:$0xf0]  ;;  %v2998_v20 = vor.u32 %v4377_v13, %v2997_v12  ;;  %v4364_v21 = vld [vmem:[#allocation2 + $0x4] sm:$0xf] }
  0x23   :  { %487 = vmatpush.bf16.msra.mxu0 %v3054_v56  ;;  %501 = vmatpush.bf16.msra.mxu1 %v3058_v57  ;;  %v2959_v22 = vld [vmem:[#allocation2 + $0x20] sm:$0xf0]  ;;  %v2965_v23 = vld [vmem:[#allocation2 + $0x8] sm:$0xf]  ;;  %v3002_v24 = vor.u32 %v4373_v14, %v2999_v15  ;;  %v4365_v26 = vld [vmem:[#allocation2 + $0xc] sm:$0xf]  ;;  %v2958_v31 = vor.u32 %v4368_v18, %v2957_v17 }
  0x24   :  { %515 = vmatpush.bf16.msra.mxu2 %v3062_v58  ;;  %v4369_v25 = vld [vmem:[#allocation2 + $0x24] sm:$0xf0]  ;;  %v2967_v27 = vld [vmem:[#allocation2 + $0x28] sm:$0xf0]  ;;  %v3197_v28 = vld [vmem:[#allocation2 + $0x1d0] sm:$0xf]  ;;  %v2962_v35 = vor.u32 %v4364_v21, %v2959_v22 }
  0x25   :  { %529 = vmatpush.bf16.msra.mxu3 %v3066_v62  ;;  %v4426_v29 = vld [vmem:[#allocation2 + $0x1ec] sm:$0xf0]  ;;  %v4422_v30 = vld [vmem:[#allocation2 + $0x1d4] sm:$0xf]  ;;  %v3205_v33 = vld [vmem:[#allocation2 + $0x1d8] sm:$0xf]  ;;  %v2966_v36 = vor.u32 %v4369_v25, %v2965_v23  ;;  %v2970_v39 = vor.u32 %v4365_v26, %v2967_v27 }
  0x26   :  { %v3199_v32 = vld [vmem:[#allocation2 + $0x1f0] sm:$0xf0]  ;;  %v4427_v34 = vld [vmem:[#allocation2 + $0x1f4] sm:$0xf0]  ;;  %v4423_v37 = vld [vmem:[#allocation2 + $0x1dc] sm:$0xf]  ;;  %v3198_v40 = vor.u32 %v4426_v29, %v3197_v28 }
  0x27   :  { %488 = vmatpush.bf16.msra.mxu0 %v3022_v4  ;;  %502 = vmatpush.bf16.msra.mxu1 %v3026_v5  ;;  %v3207_v38 = vld [vmem:[#allocation2 + $0x1f8] sm:$0xf0]  ;;  %v4868_v41 = vld [vmem:[%s4996_s0] sm:$0xff]  ;;  %v3202_v42 = vor.u32 %v4422_v30, %v3199_v32  ;;  %v3206_v43 = vor.u32 %v4427_v34, %v3205_v33  ;;  %v3165_v44 = vld [vmem:[#allocation2 + $0x190] sm:$0xf] }
  0x28   :  { %516 = vmatpush.bf16.msra.mxu2 %v3030_v6  ;;  %v4418_v45 = vld [vmem:[#allocation2 + $0x1ac] sm:$0xf0]  ;;  %v4414_v46 = vld [vmem:[#allocation2 + $0x194] sm:$0xf]  ;;  %v3210_v47 = vor.u32 %v4423_v37, %v3207_v38  ;;  %v3173_v49 = vld [vmem:[#allocation2 + $0x198] sm:$0xf] }
  0x29   :  { %530 = vmatpush.bf16.msra.mxu3 %v3034_v10  ;;  %v3167_v48 = vld [vmem:[#allocation2 + $0x1b0] sm:$0xf0]  ;;  %v4419_v50 = vld [vmem:[#allocation2 + $0x1b4] sm:$0xf0]  ;;  %v4415_v51 = vld [vmem:[#allocation2 + $0x19c] sm:$0xf]  ;;  %v3166_v53 = vor.u32 %v4418_v45, %v3165_v44 }
  0x2a   :  { %v3175_v52 = vld [vmem:[#allocation2 + $0x1b8] sm:$0xf0]  ;;  %v3170_v54 = vor.u32 %v4414_v46, %v3167_v48  ;;  %v3174_v55 = vor.u32 %v4419_v50, %v3173_v49  ;;  %v3133_v56 = vld [vmem:[#allocation2 + $0x150] sm:$0xf]  ;;  %v4406_v58 = vld [vmem:[#allocation2 + $0x154] sm:$0xf] }
  0x2b   :  { %489 = vmatpush.bf16.msra.mxu0 %v2990_v16  ;;  %503 = vmatpush.bf16.msra.mxu1 %v2994_v19  ;;  %v4410_v57 = vld [vmem:[#allocation2 + $0x16c] sm:$0xf0]  ;;  %v3178_v59 = vor.u32 %v4415_v51, %v3175_v52  ;;  %v3135_v60 = vld [vmem:[#allocation2 + $0x170] sm:$0xf0]  ;;  %v3141_v61 = vld [vmem:[#allocation2 + $0x158] sm:$0xf] }
  0x2c   :  { %517 = vmatpush.bf16.msra.mxu2 %v2998_v20  ;;  %v4411_v62 = vld [vmem:[#allocation2 + $0x174] sm:$0xf0]  ;;  %v4407_v63 = vld [vmem:[#allocation2 + $0x15c] sm:$0xf]  ;;  %v3134_v1 = vor.u32 %v4410_v57, %v3133_v56  ;;  %v3138_v2 = vor.u32 %v4406_v58, %v3135_v60  ;;  %v3101_v4 = vld [vmem:[#allocation2 + $0x110] sm:$0xf] }
  0x2d   :  { %531 = vmatpush.bf16.msra.mxu3 %v3002_v24  ;;  %v3143_v0 = vld [vmem:[#allocation2 + $0x178] sm:$0xf0]  ;;  %v3142_v3 = vor.u32 %v4411_v62, %v3141_v61  ;;  %v4402_v5 = vld [vmem:[#allocation2 + $0x12c] sm:$0xf0]  ;;  %v4398_v6 = vld [vmem:[#allocation2 + $0x114] sm:$0xf] }
  0x2e   :  { %v3146_v7 = vor.u32 %v4407_v63, %v3143_v0  ;;  %v3103_v8 = vld [vmem:[#allocation2 + $0x130] sm:$0xf0]  ;;  %v3109_v9 = vld [vmem:[#allocation2 + $0x118] sm:$0xf]  ;;  %v4399_v11 = vld [vmem:[#allocation2 + $0x11c] sm:$0xf]  ;;  %v3102_v13 = vor.u32 %v4402_v5, %v3101_v4 }
  0x2f   :  { %490 = vmatpush.bf16.msra.mxu0 %v2958_v31  ;;  %504 = vmatpush.bf16.msra.mxu1 %v2962_v35  ;;  %v4403_v10 = vld [vmem:[#allocation2 + $0x134] sm:$0xf0]  ;;  %v3111_v12 = vld [vmem:[#allocation2 + $0x138] sm:$0xf0]  ;;  %v3106_v14 = vor.u32 %v4398_v6, %v3103_v8  ;;  %v3069_v16 = vld [vmem:[#allocation2 + $0xd0] sm:$0xf] }
  0x30   :  { %518 = vmatpush.bf16.msra.mxu2 %v2966_v36  ;;  %v3110_v15 = vor.u32 %v4403_v10, %v3109_v9  ;;  %v4394_v17 = vld [vmem:[#allocation2 + $0xec] sm:$0xf0]  ;;  %v4390_v18 = vld [vmem:[#allocation2 + $0xd4] sm:$0xf]  ;;  %v3114_v19 = vor.u32 %v4399_v11, %v3111_v12  ;;  %v3077_v21 = vld [vmem:[#allocation2 + $0xd8] sm:$0xf] }
  0x31   :  { %532 = vmatpush.bf16.msra.mxu3 %v2970_v39  ;;  %v3071_v20 = vld [vmem:[#allocation2 + $0xf0] sm:$0xf0]  ;;  %v4395_v22 = vld [vmem:[#allocation2 + $0xf4] sm:$0xf0]  ;;  %v4391_v23 = vld [vmem:[#allocation2 + $0xdc] sm:$0xf]  ;;  %v3070_v25 = vor.u32 %v4394_v17, %v3069_v16 }
  0x32   :  { %491 = vmatmul.bf16.vlgmr.msra.gmra.mxu0 %v4868_v41  ;;  %505 = vmatmul.bf16.vlgmr.msra.gmra.mxu1 %v4868_v41  ;;  %v3079_v24 = vld [vmem:[#allocation2 + $0xf8] sm:$0xf0]  ;;  %v3074_v26 = vor.u32 %v4390_v18, %v3071_v20  ;;  %v3078_v27 = vor.u32 %v4395_v22, %v3077_v21  ;;  %v3037_v28 = vld [vmem:[#allocation2 + $0x90] sm:$0xf]  ;;  %v4382_v30 = vld [vmem:[#allocation2 + $0x94] sm:$0xf] }
  0x33   :  { %539 = vmatpush.bf16.msrb.mxu0 %v3198_v40  ;;  %553 = vmatpush.bf16.msrb.mxu1 %v3202_v42  ;;  %v4386_v29 = vld [vmem:[#allocation2 + $0xac] sm:$0xf0]  ;;  %v3082_v31 = vor.u32 %v4391_v23, %v3079_v24  ;;  %v3039_v32 = vld [vmem:[#allocation2 + $0xb0] sm:$0xf0]  ;;  %v3045_v33 = vld [vmem:[#allocation2 + $0x98] sm:$0xf] }
  0x34   :  { %567 = vmatpush.bf16.msrb.mxu2 %v3206_v43  ;;  %533 = vmatmul.bf16.vlgmr.msra.gmra.mxu3 %v4868_v41  ;;  %v4387_v34 = vld [vmem:[#allocation2 + $0xb4] sm:$0xf0]  ;;  %v4383_v35 = vld [vmem:[#allocation2 + $0x9c] sm:$0xf]  ;;  %v3038_v37 = vor.u32 %v4386_v29, %v3037_v28  ;;  %v3042_v38 = vor.u32 %v4382_v30, %v3039_v32  ;;  %v3005_v40 = vld [vmem:[#allocation2 + $0x50] sm:$0xf] }
  0x35   :  { %581 = vmatpush.bf16.msrb.mxu3 %v3210_v47  ;;  %519 = vmatmul.bf16.vlgmr.msra.gmra.mxu2 %v4868_v41  ;;  %v3047_v36 = vld [vmem:[#allocation2 + $0xb8] sm:$0xf0]  ;;  %v3046_v39 = vor.u32 %v4387_v34, %v3045_v33  ;;  %v4378_v42 = vld [vmem:[#allocation2 + $0x6c] sm:$0xf0]  ;;  %v4374_v43 = vld [vmem:[#allocation2 + $0x54] sm:$0xf] }
  0x36   :  { %v3050_v44 = vor.u32 %v4383_v35, %v3047_v36  ;;  %v3007_v45 = vld [vmem:[#allocation2 + $0x70] sm:$0xf0]  ;;  %v3013_v46 = vld [vmem:[#allocation2 + $0x58] sm:$0xf]  ;;  %v4375_v48 = vld [vmem:[#allocation2 + $0x5c] sm:$0xf]  ;;  %v3006_v50 = vor.u32 %v4378_v42, %v3005_v40 }
  0x37   :  { %540 = vmatpush.bf16.msrb.mxu0 %v3166_v53  ;;  %554 = vmatpush.bf16.msrb.mxu1 %v3170_v54  ;;  %v4379_v47 = vld [vmem:[#allocation2 + $0x74] sm:$0xf0]  ;;  %v3015_v49 = vld [vmem:[#allocation2 + $0x78] sm:$0xf0]  ;;  %v2973_v51 = vld [vmem:[#allocation2 + $0x10] sm:$0xf]  ;;  %v3010_v52 = vor.u32 %v4374_v43, %v3007_v45 }
  0x38   :  { %568 = vmatpush.bf16.msrb.mxu2 %v3174_v55  ;;  %v3014_v53 = vor.u32 %v4379_v47, %v3013_v46  ;;  %v4370_v54 = vld [vmem:[#allocation2 + $0x2c] sm:$0xf0]  ;;  %v4366_v55 = vld [vmem:[#allocation2 + $0x14] sm:$0xf]  ;;  %v3018_v57 = vor.u32 %v4375_v48, %v3015_v49  ;;  %v2981_v58 = vld [vmem:[#allocation2 + $0x18] sm:$0xf] }
  0x39   :  { %582 = vmatpush.bf16.msrb.mxu3 %v3178_v59  ;;  %v2975_v56 = vld [vmem:[#allocation2 + $0x30] sm:$0xf0]  ;;  %v4371_v59 = vld [vmem:[#allocation2 + $0x34] sm:$0xf0]  ;;  %v4367_v60 = vld [vmem:[#allocation2 + $0x1c] sm:$0xf]  ;;  %v2974_v0 = vor.u32 %v4370_v54, %v2973_v51 }
  0x3a   :  { %v2983_v61 = vld [vmem:[#allocation2 + $0x38] sm:$0xf0]  ;;  %v3325_v62 = vld [vmem:[#allocation4 + $0xe0] sm:$0xf]  ;;  %v4458_v63 = vld [vmem:[#allocation4 + $0xec] sm:$0xf0]  ;;  %v2982_v4 = vor.u32 %v4371_v59, %v2981_v58 }
  0x3b   :  { %541 = vmatpush.bf16.msrb.mxu0 %v3134_v1  ;;  %555 = vmatpush.bf16.msrb.mxu1 %v3138_v2  ;;  %v3453_v1 = vld [vmem:[#allocation4 + $0x1e0] sm:$0xf]  ;;  %v4490_v2 = vld [vmem:[#allocation4 + $0x1ec] sm:$0xf0]  ;;  %v2986_v5 = vor.u32 %v4367_v60, %v2983_v61  ;;  %v3326_v6 = vor.u32 %v4458_v63, %v3325_v62 }
  0x3c   :  { %569 = vmatpush.bf16.msrb.mxu2 %v3142_v3  ;;  %v2978_v3 = vor.u32 %v4366_v55, %v2975_v56  ;;  %v3581_v8 = vld [vmem:[#allocation4 + $0x2e0] sm:$0xf]  ;;  %v4522_v9 = vld [vmem:[#allocation4 + $0x2ec] sm:$0xf0]  ;;  %v3454_v10 = vor.u32 %v4490_v2, %v3453_v1 }
  0x3d   :  { %583 = vmatpush.bf16.msrb.mxu3 %v3146_v7  ;;  %v3309_v7 = vld [vmem:[#allocation4 + $0xc0] sm:$0xf]  ;;  %v4454_v11 = vld [vmem:[#allocation4 + $0xcc] sm:$0xf0]  ;;  %v3582_v16 = vor.u32 %v4522_v9, %v3581_v8 }
  0x3e   :  { %v3709_v12 = vld [vmem:[#allocation4 + $0x3e0] sm:$0xf]  ;;  %v3310_v17 = vor.u32 %v4454_v11, %v3309_v7  ;;  %v4518_v21 = vld [vmem:[#allocation4 + $0x2cc] sm:$0xf0] }
  0x3f   :  { %542 = vmatpush.bf16.msrb.mxu0 %v3102_v13  ;;  %556 = vmatpush.bf16.msrb.mxu1 %v3106_v14  ;;  %v4554_v13 = vld [vmem:[#allocation4 + $0x3ec] sm:$0xf0]  ;;  %v3437_v14 = vld [vmem:[#allocation4 + $0x1c0] sm:$0xf] }
  0x40   :  { %570 = vmatpush.bf16.msrb.mxu2 %v3110_v15  ;;  %v4486_v15 = vld [vmem:[#allocation4 + $0x1cc] sm:$0xf0]  ;;  %v3710_v18 = vor.u32 %v4554_v13, %v3709_v12  ;;  %v3565_v20 = vld [vmem:[#allocation4 + $0x2c0] sm:$0xf] }
  0x41   :  { %584 = vmatpush.bf16.msrb.mxu3 %v3114_v19  ;;  %v3293_v19 = vld [vmem:[#allocation4 + $0xa0] sm:$0xf]  ;;  %v3438_v22 = vor.u32 %v4486_v15, %v3437_v14  ;;  %v4450_v23 = vld [vmem:[#allocation4 + $0xac] sm:$0xf0]  ;;  %v3566_v28 = vor.u32 %v4518_v21, %v3565_v20 }
  0x42   :  { %v3693_v24 = vld [vmem:[#allocation4 + $0x3c0] sm:$0xf]  ;;  %v3294_v29 = vor.u32 %v4450_v23, %v3293_v19  ;;  %v4514_v33 = vld [vmem:[#allocation4 + $0x2ac] sm:$0xf0] }
  0x43   :  { %543 = vmatpush.bf16.msrb.mxu0 %v3070_v25  ;;  %557 = vmatpush.bf16.msrb.mxu1 %v3074_v26  ;;  %v4550_v25 = vld [vmem:[#allocation4 + $0x3cc] sm:$0xf0]  ;;  %v3421_v26 = vld [vmem:[#allocation4 + $0x1a0] sm:$0xf] }
  0x44   :  { %571 = vmatpush.bf16.msrb.mxu2 %v3078_v27  ;;  %v4482_v27 = vld [vmem:[#allocation4 + $0x1ac] sm:$0xf0]  ;;  %v3694_v30 = vor.u32 %v4550_v25, %v3693_v24  ;;  %v3549_v32 = vld [vmem:[#allocation4 + $0x2a0] sm:$0xf] }
  0x45   :  { %585 = vmatpush.bf16.msrb.mxu3 %v3082_v31  ;;  %v3277_v31 = vld [vmem:[#allocation4 + $0x80] sm:$0xf]  ;;  %v3422_v34 = vor.u32 %v4482_v27, %v3421_v26  ;;  %v4446_v35 = vld [vmem:[#allocation4 + $0x8c] sm:$0xf0]  ;;  %v3550_v40 = vor.u32 %v4514_v33, %v3549_v32 }
  0x46   :  { %v3677_v36 = vld [vmem:[#allocation4 + $0x3a0] sm:$0xf]  ;;  %v4510_v45 = vld [vmem:[#allocation4 + $0x28c] sm:$0xf0] }
  0x47   :  { %544 = vmatpush.bf16.msrb.mxu0 %v3038_v37  ;;  %558 = vmatpush.bf16.msrb.mxu1 %v3042_v38  ;;  %v4546_v37 = vld [vmem:[#allocation4 + $0x3ac] sm:$0xf0]  ;;  %v3405_v38 = vld [vmem:[#allocation4 + $0x180] sm:$0xf] }
  0x48   :  { %572 = vmatpush.bf16.msrb.mxu2 %v3046_v39  ;;  %v4478_v39 = vld [vmem:[#allocation4 + $0x18c] sm:$0xf0]  ;;  %v3261_v42 = vld [vmem:[#allocation4 + $0x60] sm:$0xf]  ;;  %v3678_v43 = vor.u32 %v4546_v37, %v3677_v36 }
  0x49   :  { %586 = vmatpush.bf16.msrb.mxu3 %v3050_v44  ;;  %v3533_v44 = vld [vmem:[#allocation4 + $0x280] sm:$0xf]  ;;  %v3406_v46 = vor.u32 %v4478_v39, %v3405_v38  ;;  %v4442_v47 = vld [vmem:[#allocation4 + $0x6c] sm:$0xf0] }
  0x4a   :  { %v3661_v48 = vld [vmem:[#allocation4 + $0x380] sm:$0xf]  ;;  %v4542_v49 = vld [vmem:[#allocation4 + $0x38c] sm:$0xf0] }
  0x4b   :  { %545 = vmatpush.bf16.msrb.mxu0 %v3006_v50  ;;  %559 = vmatpush.bf16.msrb.mxu1 %v3010_v52  ;;  %v3389_v50 = vld [vmem:[#allocation4 + $0x160] sm:$0xf]  ;;  %v4474_v51 = vld [vmem:[#allocation4 + $0x16c] sm:$0xf0]  ;;  %v3534_v52 = vor.u32 %v4510_v45, %v3533_v44  ;;  %v3662_v54 = vor.u32 %v4542_v49, %v3661_v48 }
  0x4c   :  { %573 = vmatpush.bf16.msrb.mxu2 %v3014_v53  ;;  %v3262_v53 = vor.u32 %v4442_v47, %v3261_v42  ;;  %v3245_v55 = vld [vmem:[#allocation4 + $0x40] sm:$0xf]  ;;  %v3390_v58 = vor.u32 %v4474_v51, %v3389_v50  ;;  %v4438_v59 = vld [vmem:[#allocation4 + $0x4c] sm:$0xf0] }
  0x4d   :  { %587 = vmatpush.bf16.msrb.mxu3 %v3018_v57  ;;  %v3517_v56 = vld [vmem:[#allocation4 + $0x260] sm:$0xf]  ;;  %v4506_v57 = vld [vmem:[#allocation4 + $0x26c] sm:$0xf0]  ;;  %v3246_v1 = vor.u32 %v4438_v59, %v3245_v55 }
  0x4e   :  { %v3645_v60 = vld [vmem:[#allocation4 + $0x360] sm:$0xf]  ;;  %v4538_v61 = vld [vmem:[#allocation4 + $0x36c] sm:$0xf0] }
  0x4f   :  { %546 = vmatpush.bf16.msrb.mxu0 %v2974_v0  ;;  %560 = vmatpush.bf16.msrb.mxu1 %v2978_v3  ;;  %v3373_v62 = vld [vmem:[#allocation4 + $0x140] sm:$0xf]  ;;  %v4470_v63 = vld [vmem:[#allocation4 + $0x14c] sm:$0xf0]  ;;  %v3518_v0 = vor.u32 %v4506_v57, %v3517_v56  ;;  %v3646_v2 = vor.u32 %v4538_v61, %v3645_v60 }
  0x50   :  { %574 = vmatpush.bf16.msrb.mxu2 %v2982_v4  ;;  %v3229_v3 = vld [vmem:[#allocation4 + $0x20] sm:$0xf]  ;;  %v4434_v7 = vld [vmem:[#allocation4 + $0x2c] sm:$0xf0] }
  0x51   :  { %588 = vmatpush.bf16.msrb.mxu3 %v2986_v5  ;;  %v3501_v4 = vld [vmem:[#allocation4 + $0x240] sm:$0xf]  ;;  %v4502_v5 = vld [vmem:[#allocation4 + $0x24c] sm:$0xf0]  ;;  %v3230_v14 = vor.u32 %v4434_v7, %v3229_v3 }
  0x52   :  { %547 = vmatmul.bf16.vlgmr.msrb.gmra.mxu0 %v4868_v41  ;;  %561 = vmatmul.bf16.vlgmr.msrb.gmra.mxu1 %v4868_v41  ;;  %v3629_v8 = vld [vmem:[#allocation4 + $0x340] sm:$0xf]  ;;  %v4534_v9 = vld [vmem:[#allocation4 + $0x34c] sm:$0xf0]  ;;  %v3502_v12 = vor.u32 %v4502_v5, %v3501_v4 }
  0x53   :  { %2165 = vmatpush.bf16.msra.mxu0 %v3326_v6  ;;  %2179 = vmatpush.bf16.msra.mxu1 %v3454_v10  ;;  %v3374_v6 = vor.u32 %v4470_v63, %v3373_v62  ;;  %v3357_v10 = vld [vmem:[#allocation4 + $0x120] sm:$0xf]  ;;  %v4466_v11 = vld [vmem:[#allocation4 + $0x12c] sm:$0xf0]  ;;  %v3630_v15 = vor.u32 %v4534_v9, %v3629_v8 }
  0x54   :  { %575 = vmatmul.bf16.vlgmr.msrb.gmra.mxu2 %v4868_v41  ;;  %589 = vmatmul.bf16.vlgmr.msrb.gmra.mxu3 %v4868_v41  ;;  %v3278_v41 = vor.u32 %v4446_v35, %v3277_v31  ;;  %v3213_v13 = vld [vmem:[#allocation4] sm:$0xf]  ;;  %v3358_v19 = vor.u32 %v4466_v11, %v3357_v10  ;;  %v4462_v23 = vld [vmem:[#allocation4 + $0x10c] sm:$0xf0] }
  0x55   :  { %2193 = vmatpush.bf16.msra.mxu2 %v3582_v16  ;;  %2207 = vmatpush.bf16.msra.mxu3 %v3710_v18  ;;  %v4430_v16 = vld [vmem:[#allocation4 + $0xc] sm:$0xf0]  ;;  %v3341_v20 = vld [vmem:[#allocation4 + $0x100] sm:$0xf] }
  0x56   :  { %v4498_v18 = vld [vmem:[#allocation4 + $0x22c] sm:$0xf0]  ;;  %v3613_v21 = vld [vmem:[#allocation4 + $0x320] sm:$0xf]  ;;  %v3342_v35 = vor.u32 %v4462_v23, %v3341_v20 }
  0x57   :  { %2166 = vmatpush.bf16.msra.mxu0 %v3310_v17  ;;  %2180 = vmatpush.bf16.msra.mxu1 %v3438_v22  ;;  %v3485_v17 = vld [vmem:[#allocation4 + $0x220] sm:$0xf]  ;;  %v4530_v22 = vld [vmem:[#allocation4 + $0x32c] sm:$0xf0] }
  0x58   :  { %v3837_v24 = vld [vmem:[#allocation4 + $0x4e0] sm:$0xf]  ;;  %v4586_v25 = vld [vmem:[#allocation4 + $0x4ec] sm:$0xf0] }
  0x59   :  { %2194 = vmatpush.bf16.msra.mxu2 %v3566_v28  ;;  %2208 = vmatpush.bf16.msra.mxu3 %v3694_v30  ;;  %v3965_v26 = vld [vmem:[#allocation4 + $0x5e0] sm:$0xf]  ;;  %v4618_v27 = vld [vmem:[#allocation4 + $0x5ec] sm:$0xf0]  ;;  %v3486_v28 = vor.u32 %v4498_v18, %v3485_v17  ;;  %v3614_v30 = vor.u32 %v4530_v22, %v3613_v21  ;;  %v3838_v36 = vor.u32 %v4586_v25, %v3837_v24 }
  0x5a   :  { %v3821_v31 = vld [vmem:[#allocation4 + $0x4c0] sm:$0xf]  ;;  %v4494_v33 = vld [vmem:[#allocation4 + $0x20c] sm:$0xf0] }
  0x5b   :  { %2167 = vmatpush.bf16.msra.mxu0 %v3294_v29  ;;  %2181 = vmatpush.bf16.msra.mxu1 %v3422_v34  ;;  %v3214_v29 = vor.u32 %v4430_v16, %v3213_v13  ;;  %v3469_v32 = vld [vmem:[#allocation4 + $0x200] sm:$0xf]  ;;  %v4526_v37 = vld [vmem:[#allocation4 + $0x30c] sm:$0xf0] }
  0x5c   :  { %v3597_v34 = vld [vmem:[#allocation4 + $0x300] sm:$0xf]  ;;  %v4650_v39 = vld [vmem:[#allocation4 + $0x6ec] sm:$0xf0] }
  0x5d   :  { %2195 = vmatpush.bf16.msra.mxu2 %v3550_v40  ;;  %2209 = vmatpush.bf16.msra.mxu3 %v3678_v43  ;;  %v4093_v38 = vld [vmem:[#allocation4 + $0x6e0] sm:$0xf]  ;;  %v3966_v40 = vor.u32 %v4618_v27, %v3965_v26  ;;  %v4582_v42 = vld [vmem:[#allocation4 + $0x4cc] sm:$0xf0]  ;;  %v3598_v47 = vor.u32 %v4526_v37, %v3597_v34 }
  0x5e   :  { %v4682_v43 = vld [vmem:[#allocation4 + $0x7ec] sm:$0xf0]  ;;  %v3949_v44 = vld [vmem:[#allocation4 + $0x5c0] sm:$0xf]  ;;  %v4094_v48 = vor.u32 %v4650_v39, %v4093_v38  ;;  %v3822_v49 = vor.u32 %v4582_v42, %v3821_v31 }
  0x5f   :  { %2168 = vmatpush.bf16.msra.mxu0 %v3278_v41  ;;  %2182 = vmatpush.bf16.msra.mxu1 %v3406_v46  ;;  %v4221_v41 = vld [vmem:[#allocation4 + $0x7e0] sm:$0xf]  ;;  %v4614_v45 = vld [vmem:[#allocation4 + $0x5cc] sm:$0xf0]  ;;  %v3470_v46 = vor.u32 %v4494_v33, %v3469_v32 }
  0x60   :  { %v4222_v50 = vor.u32 %v4682_v43, %v4221_v41  ;;  %v3805_v51 = vld [vmem:[#allocation4 + $0x4a0] sm:$0xf]  ;;  %v4578_v55 = vld [vmem:[#allocation4 + $0x4ac] sm:$0xf0] }
  0x61   :  { %2196 = vmatpush.bf16.msra.mxu2 %v3534_v52  ;;  %2210 = vmatpush.bf16.msra.mxu3 %v3662_v54  ;;  %v4077_v52 = vld [vmem:[#allocation4 + $0x6c0] sm:$0xf]  ;;  %v3950_v54 = vor.u32 %v4614_v45, %v3949_v44  ;;  %v4678_v57 = vld [vmem:[#allocation4 + $0x7cc] sm:$0xf0]  ;;  %v3806_v61 = vor.u32 %v4578_v55, %v3805_v51 }
  0x62   :  { %v4205_v56 = vld [vmem:[#allocation4 + $0x7c0] sm:$0xf]  ;;  %v4610_v59 = vld [vmem:[#allocation4 + $0x5ac] sm:$0xf0] }
  0x63   :  { %2169 = vmatpush.bf16.msra.mxu0 %v3262_v53  ;;  %2183 = vmatpush.bf16.msra.mxu1 %v3390_v58  ;;  %v4646_v53 = vld [vmem:[#allocation4 + $0x6cc] sm:$0xf0]  ;;  %v3933_v58 = vld [vmem:[#allocation4 + $0x5a0] sm:$0xf]  ;;  %v4206_v62 = vor.u32 %v4678_v57, %v4205_v56 }
  0x64   :  { %v4078_v60 = vor.u32 %v4646_v53, %v4077_v52  ;;  %v3934_v63 = vor.u32 %v4610_v59, %v3933_v58  ;;  %v4606_v3 = vld [vmem:[#allocation4 + $0x58c] sm:$0xf0]  ;;  %v4189_v8 = vld [vmem:[#allocation4 + $0x7a0] sm:$0xf] }
  0x65   :  { %2197 = vmatpush.bf16.msra.mxu2 %v3518_v0  ;;  %2211 = vmatpush.bf16.msra.mxu3 %v3646_v2  ;;  %v3789_v0 = vld [vmem:[#allocation4 + $0x480] sm:$0xf]  ;;  %v4642_v7 = vld [vmem:[#allocation4 + $0x6ac] sm:$0xf0] }
  0x66   :  { %v3917_v2 = vld [vmem:[#allocation4 + $0x580] sm:$0xf]  ;;  %v4674_v10 = vld [vmem:[#allocation4 + $0x7ac] sm:$0xf0] }
  0x67   :  { %2170 = vmatpush.bf16.msra.mxu0 %v3246_v1  ;;  %2184 = vmatpush.bf16.msra.mxu1 %v3374_v6  ;;  %v4574_v1 = vld [vmem:[#allocation4 + $0x48c] sm:$0xf0]  ;;  %v3918_v5 = vor.u32 %v4606_v3, %v3917_v2  ;;  %v4061_v6 = vld [vmem:[#allocation4 + $0x6a0] sm:$0xf]  ;;  %v4190_v11 = vor.u32 %v4674_v10, %v4189_v8 }
  0x68   :  { %v3790_v4 = vor.u32 %v4574_v1, %v3789_v0  ;;  %v4062_v9 = vor.u32 %v4642_v7, %v4061_v6  ;;  %v4570_v13 = vld [vmem:[#allocation4 + $0x46c] sm:$0xf0]  ;;  %v4045_v18 = vld [vmem:[#allocation4 + $0x680] sm:$0xf] }
  0x69   :  { %2198 = vmatpush.bf16.msra.mxu2 %v3502_v12  ;;  %2212 = vmatpush.bf16.msra.mxu3 %v3630_v15  ;;  %v3773_v12 = vld [vmem:[#allocation4 + $0x460] sm:$0xf]  ;;  %v4602_v16 = vld [vmem:[#allocation4 + $0x56c] sm:$0xf0] }
  0x6a   :  { %v3774_v15 = vor.u32 %v4570_v13, %v3773_v12  ;;  %v4173_v21 = vld [vmem:[#allocation4 + $0x780] sm:$0xf]  ;;  %v4670_v22 = vld [vmem:[#allocation4 + $0x78c] sm:$0xf0] }
  0x6b   :  { %2171 = vmatpush.bf16.msra.mxu0 %v3230_v14  ;;  %2185 = vmatpush.bf16.msra.mxu1 %v3358_v19  ;;  %v3901_v14 = vld [vmem:[#allocation4 + $0x560] sm:$0xf]  ;;  %v4638_v19 = vld [vmem:[#allocation4 + $0x68c] sm:$0xf0]  ;;  %v4174_v23 = vor.u32 %v4670_v22, %v4173_v21  ;;  %v3455_v21 = vld [vmem:[#allocation4 + $0x1f0] sm:$0xf0] }
  0x6c   :  { %v3902_v17 = vor.u32 %v4602_v16, %v3901_v14  ;;  %v4046_v20 = vor.u32 %v4638_v19, %v4045_v18  ;;  %v3757_v24 = vld [vmem:[#allocation4 + $0x440] sm:$0xf]  ;;  %v4566_v25 = vld [vmem:[#allocation4 + $0x44c] sm:$0xf0]  ;;  %v3327_v16 = vld [vmem:[#allocation4 + $0xf0] sm:$0xf0] }
  0x6d   :  { %2199 = vmatpush.bf16.msra.mxu2 %v3486_v28  ;;  %2213 = vmatpush.bf16.msra.mxu3 %v3614_v30  ;;  %v3885_v26 = vld [vmem:[#allocation4 + $0x540] sm:$0xf]  ;;  %v3758_v27 = vor.u32 %v4566_v25, %v3757_v24  ;;  %v4598_v28 = vld [vmem:[#allocation4 + $0x54c] sm:$0xf0] }
  0x6e   :  { %v4029_v30 = vld [vmem:[#allocation4 + $0x660] sm:$0xf]  ;;  %v4634_v31 = vld [vmem:[#allocation4 + $0x66c] sm:$0xf0] }
  0x6f   :  { %2172 = vmatpush.bf16.msra.mxu0 %v3214_v29  ;;  %2186 = vmatpush.bf16.msra.mxu1 %v3342_v35  ;;  %v3886_v29 = vor.u32 %v4598_v28, %v3885_v26  ;;  %v4157_v32 = vld [vmem:[#allocation4 + $0x760] sm:$0xf]  ;;  %v4030_v33 = vor.u32 %v4634_v31, %v4029_v30  ;;  %v4666_v34 = vld [vmem:[#allocation4 + $0x76c] sm:$0xf0]  ;;  %v4452_v28 = vld [vmem:[#allocation4 + $0xc4] sm:$0xf] }
  0x70   :  { %v4158_v35 = vor.u32 %v4666_v34, %v4157_v32  ;;  %v4562_v37 = vld [vmem:[#allocation4 + $0x42c] sm:$0xf0]  ;;  %v3869_v39 = vld [vmem:[#allocation4 + $0x520] sm:$0xf]  ;;  %v4484_v32 = vld [vmem:[#allocation4 + $0x1c4] sm:$0xf] }
  0x71   :  { %2200 = vmatpush.bf16.msra.mxu2 %v3470_v46  ;;  %2214 = vmatpush.bf16.msra.mxu3 %v3598_v47  ;;  %v4013_v41 = vld [vmem:[#allocation4 + $0x640] sm:$0xf]  ;;  %v4630_v43 = vld [vmem:[#allocation4 + $0x64c] sm:$0xf0] }
  0x72   :  { %v4141_v44 = vld [vmem:[#allocation4 + $0x740] sm:$0xf]  ;;  %v4014_v45 = vor.u32 %v4630_v43, %v4013_v41  ;;  %v4662_v46 = vld [vmem:[#allocation4 + $0x74c] sm:$0xf0] }
  0x73   :  { %2221 = vmatpush.bf16.msrb.mxu0 %v3838_v36  ;;  %2235 = vmatpush.bf16.msrb.mxu1 %v3966_v40  ;;  %v3741_v36 = vld [vmem:[#allocation4 + $0x420] sm:$0xf]  ;;  %v4594_v40 = vld [vmem:[#allocation4 + $0x52c] sm:$0xf0]  ;;  %v4142_v47 = vor.u32 %v4662_v46, %v4141_v44  ;;  %v3711_v44 = vld [vmem:[#allocation4 + $0x3f0] sm:$0xf0] }
  0x74   :  { %v3742_v38 = vor.u32 %v4562_v37, %v3741_v36  ;;  %v3870_v42 = vor.u32 %v4594_v40, %v3869_v39  ;;  %v4590_v52 = vld [vmem:[#allocation4 + $0x50c] sm:$0xf0]  ;;  %v4125_v56 = vld [vmem:[#allocation4 + $0x720] sm:$0xf]  ;;  %v4520_v39 = vld [vmem:[#allocation4 + $0x2e4] sm:$0xf] }
  0x75   :  { %2249 = vmatpush.bf16.msrb.mxu2 %v4094_v48  ;;  %2263 = vmatpush.bf16.msrb.mxu3 %v4222_v50  ;;  %v3725_v48 = vld [vmem:[#allocation4 + $0x400] sm:$0xf]  ;;  %v4626_v55 = vld [vmem:[#allocation4 + $0x62c] sm:$0xf0]  ;;  %v3583_v40 = vld [vmem:[#allocation4 + $0x2f0] sm:$0xf0] }
  0x76   :  { %v3853_v50 = vld [vmem:[#allocation4 + $0x500] sm:$0xf]  ;;  %v4658_v57 = vld [vmem:[#allocation4 + $0x72c] sm:$0xf0]  ;;  %v3295_v46 = vld [vmem:[#allocation4 + $0xb0] sm:$0xf0] }
  0x77   :  { %2222 = vmatpush.bf16.msrb.mxu0 %v3822_v49  ;;  %2236 = vmatpush.bf16.msrb.mxu1 %v3950_v54  ;;  %v4558_v49 = vld [vmem:[#allocation4 + $0x40c] sm:$0xf0]  ;;  %v3854_v53 = vor.u32 %v4590_v52, %v3853_v50  ;;  %v3997_v54 = vld [vmem:[#allocation4 + $0x620] sm:$0xf]  ;;  %v4126_v59 = vor.u32 %v4658_v57, %v4125_v56  ;;  %v3423_v50 = vld [vmem:[#allocation4 + $0x1b0] sm:$0xf0] }
  0x78   :  { %v3726_v51 = vor.u32 %v4558_v49, %v3725_v48  ;;  %v3998_v58 = vor.u32 %v4626_v55, %v3997_v54  ;;  %v4654_v0 = vld [vmem:[#allocation4 + $0x70c] sm:$0xf0]  ;;  %v4881_v2 = vld [vmem:[%s4998_s2] sm:$0xff] }
  0x79   :  { %2250 = vmatpush.bf16.msrb.mxu2 %v4078_v60  ;;  %2264 = vmatpush.bf16.msrb.mxu3 %v4206_v62  ;;  %v3981_v60 = vld [vmem:[#allocation4 + $0x600] sm:$0xf]  ;;  %v142_v6 = vperm.slane %v4881_v2, 1  ;;  %v143_v18 = vperm.slane %v4881_v2, 2  ;;  %v144_v22 = vperm.slane %v4881_v2, 3 }
  0x7a   :  { %v4480_v49 = vld [vmem:[#allocation4 + $0x1a4] sm:$0xf] }
  0x7b   :  { %2223 = vmatpush.bf16.msrb.mxu0 %v3806_v61  ;;  %2237 = vmatpush.bf16.msrb.mxu1 %v3934_v63  ;;  %v4622_v61 = vld [vmem:[#allocation4 + $0x60c] sm:$0xf0]  ;;  %v4109_v63 = vld [vmem:[#allocation4 + $0x700] sm:$0xf]  ;;  %v4516_v57 = vld [vmem:[#allocation4 + $0x2c4] sm:$0xf] }
  0x7c   :  { %v3982_v62 = vor.u32 %v4622_v61, %v3981_v60  ;;  %v4110_v1 = vor.u32 %v4654_v0, %v4109_v63  ;;  %v3426_v61 = vor.u32 %v4480_v49, %v3423_v50  ;;  %v4444_v63 = vld [vmem:[#allocation4 + $0x84] sm:$0xf]  ;;  %v3279_v0 = vld [vmem:[#allocation4 + $0x90] sm:$0xf0] }
  0x7d   :  { %2251 = vmatpush.bf16.msrb.mxu2 %v4062_v9  ;;  %2265 = vmatpush.bf16.msrb.mxu3 %v4190_v11  ;;  %v4500_v49 = vld [vmem:[#allocation4 + $0x244] sm:$0xf]  ;;  %v3503_v50 = vld [vmem:[#allocation4 + $0x250] sm:$0xf0] }
  0x7f   :  { %2224 = vmatpush.bf16.msrb.mxu0 %v3790_v4  ;;  %2238 = vmatpush.bf16.msrb.mxu1 %v3918_v5  ;;  %v141_v4 = vperm.slane %v4881_v2, 0 }
  0x81   :  { %2252 = vmatpush.bf16.msrb.mxu2 %v4046_v20  ;;  %2266 = vmatpush.bf16.msrb.mxu3 %v4174_v23  ;;  %v4488_v20 = vld [vmem:[#allocation4 + $0x1e4] sm:$0xf] }
  0x83   :  { %2225 = vmatpush.bf16.msrb.mxu0 %v3774_v15  ;;  %2239 = vmatpush.bf16.msrb.mxu1 %v3902_v17  ;;  %v4456_v15 = vld [vmem:[#allocation4 + $0xe4] sm:$0xf] }
  0x84   :  { %v3330_v25 = vor.u32 %v4456_v15, %v3327_v16  ;;  %v3391_v15 = vld [vmem:[#allocation4 + $0x170] sm:$0xf0] }
  0x85   :  { %2253 = vmatpush.bf16.msrb.mxu2 %v4030_v33  ;;  %2267 = vmatpush.bf16.msrb.mxu3 %v4158_v35  ;;  %v3439_v33 = vld [vmem:[#allocation4 + $0x1d0] sm:$0xf0] }
  0x86   :  { %v3442_v43 = vor.u32 %v4484_v32, %v3439_v33  ;;  %v3375_v32 = vld [vmem:[#allocation4 + $0x150] sm:$0xf0]  ;;  %v146_v33 = vperm.slane %v4881_v2, 5 }
  0x87   :  { %2226 = vmatpush.bf16.msrb.mxu0 %v3758_v27  ;;  %2240 = vmatpush.bf16.msrb.mxu1 %v3886_v29  ;;  %v3458_v27 = vor.u32 %v4488_v20, %v3455_v21  ;;  %v3311_v29 = vld [vmem:[#allocation4 + $0xd0] sm:$0xf0]  ;;  %v4540_v21 = vld [vmem:[#allocation4 + $0x384] sm:$0xf] }
  0x88   :  { %v3535_v20 = vld [vmem:[#allocation4 + $0x290] sm:$0xf0] }
  0x89   :  { %2254 = vmatpush.bf16.msrb.mxu2 %v4014_v45  ;;  %2268 = vmatpush.bf16.msrb.mxu3 %v4142_v47  ;;  %v4448_v45 = vld [vmem:[#allocation4 + $0xa4] sm:$0xf] }
  0x8a   :  { %v3298_v56 = vor.u32 %v4448_v45, %v3295_v46  ;;  %v4464_v45 = vld [vmem:[#allocation4 + $0x124] sm:$0xf]  ;;  %v3359_v46 = vld [vmem:[#allocation4 + $0x130] sm:$0xf0] }
  0x8b   :  { %2227 = vmatpush.bf16.msrb.mxu0 %v3742_v38  ;;  %2241 = vmatpush.bf16.msrb.mxu1 %v3870_v42  ;;  %v3314_v38 = vor.u32 %v4452_v28, %v3311_v29  ;;  %v4552_v42 = vld [vmem:[#allocation4 + $0x3e4] sm:$0xf]  ;;  %v145_v28 = vperm.slane %v4881_v2, 4 }
  0x8c   :  { %v3714_v55 = vor.u32 %v4552_v42, %v3711_v44  ;;  %v3647_v42 = vld [vmem:[#allocation4 + $0x370] sm:$0xf0] }
  0x8d   :  { %2255 = vmatpush.bf16.msrb.mxu2 %v3998_v58  ;;  %2269 = vmatpush.bf16.msrb.mxu3 %v4126_v59  ;;  %v3567_v58 = vld [vmem:[#allocation4 + $0x2d0] sm:$0xf0]  ;;  %v4548_v59 = vld [vmem:[#allocation4 + $0x3c4] sm:$0xf] }
  0x8f   :  { %2228 = vmatpush.bf16.msrb.mxu0 %v3726_v51  ;;  %2242 = vmatpush.bf16.msrb.mxu1 %v3854_v53  ;;  %v3586_v53 = vor.u32 %v4520_v39, %v3583_v40  ;;  %v4536_v39 = vld [vmem:[#allocation4 + $0x364] sm:$0xf] }
  0x91   :  { %2256 = vmatpush.bf16.msrb.mxu2 %v3982_v62  ;;  %2270 = vmatpush.bf16.msrb.mxu3 %v4110_v1  ;;  %v3695_v62 = vld [vmem:[#allocation4 + $0x3d0] sm:$0xf0]  ;;  %v4476_v1 = vld [vmem:[#allocation4 + $0x184] sm:$0xf] }
  0xaf   :  { %v492_v3 = vpop.f32.mrf.mxu0  ;;  %v506_v5 = vpop.f32.mrf.mxu1 }
  0xb0   :  { %v493_v7 = vadd.f32 %v492_v3, %v141_v4  ;;  %v507_v8 = vadd.f32 %v506_v5, %v142_v6  ;;  %v3407_v3 = vld [vmem:[#allocation4 + $0x190] sm:$0xf0]  ;;  %v3698_v5 = vor.u32 %v4548_v59, %v3695_v62 }
  0xb1   :  { %v3215_v62 = vld [vmem:[#allocation4 + $0x10] sm:$0xf0] }
  0xb2   :  { %v595_v12 = vmax.f32 %v493_v7, 0.0  ;;  %v596_v17 = vmax.f32 %v507_v8, 0.0  ;;  %v4512_v7 = vld [vmem:[#allocation4 + $0x2a4] sm:$0xf]  ;;  %v3551_v8 = vld [vmem:[#allocation4 + $0x2b0] sm:$0xf0] }
  0xb3   :  { %v3554_v16 = vor.u32 %v4512_v7, %v3551_v8  ;;  %v147_v8 = vperm.slane %v4881_v2, 6 }
  0xb7   :  { %v534_v10 = vpop.f32.mrf.mxu3  ;;  %v494_v11 = vpop.f32.mrf.mxu0 }
  0xb8   :  { %v520_v9 = vpop.f32.mrf.mxu2  ;;  %v495_v13 = vadd.f32 %v494_v11, %v141_v4  ;;  %v508_v14 = vpop.f32.mrf.mxu1  ;;  %v535_v34 = vadd.f32 %v534_v10, %v144_v22  ;;  %v3570_v4 = vor.u32 %v4516_v57, %v3567_v58  ;;  %v3410_v10 = vor.u32 %v4476_v1, %v3407_v3  ;;  %v3679_v11 = vld [vmem:[#allocation4 + $0x3b0] sm:$0xf0]  ;;  %v4428_v57 = vld [vmem:[#allocation4 + $0x4] sm:$0xf] }
  0xb9   :  { %v509_v19 = vadd.f32 %v508_v14, %v142_v6  ;;  %v521_v30 = vadd.f32 %v520_v9, %v143_v18  ;;  %v3282_v6 = vor.u32 %v4444_v63, %v3279_v0  ;;  %v4544_v9 = vld [vmem:[#allocation4 + $0x3a4] sm:$0xf]  ;;  %v3343_v0 = vld [vmem:[#allocation4 + $0x110] sm:$0xf0] }
  0xba   :  { %v603_v23 = vmax.f32 %v495_v13, 0.0  ;;  %v598_v51 = vmax.f32 %v535_v34, 0.0  ;;  %v3263_v13 = vld [vmem:[#allocation4 + $0x70] sm:$0xf0]  ;;  %v4472_v14 = vld [vmem:[#allocation4 + $0x164] sm:$0xf] }
  0xbb   :  { %v604_v24 = vmax.f32 %v509_v19, 0.0  ;;  %v597_v47 = vmax.f32 %v521_v30, 0.0  ;;  %v4508_v19 = vld [vmem:[#allocation4 + $0x284] sm:$0xf] }
  0xbc   :  { %v4887_v26 = vpack.c.bf16 %v603_v23, %v595_v12  ;;  %v4440_v12 = vld [vmem:[#allocation4 + $0x64] sm:$0xf]  ;;  %v3394_v23 = vor.u32 %v4472_v14, %v3391_v15  ;;  %v3538_v34 = vor.u32 %v4508_v19, %v3535_v20 }
  0xbd   :  { %v4889_v31 = vpack.c.bf16 %v604_v24, %v596_v17  ;;  %v3682_v17 = vor.u32 %v4544_v9, %v3679_v11  ;;  %v3663_v24 = vld [vmem:[#allocation4 + $0x390] sm:$0xf0]  ;;  %v4468_v30 = vld [vmem:[#allocation4 + $0x144] sm:$0xf] }
  0xbe   :  { %2173 = vmatmul.bf16.vlgmr.msra.gmra.mxu0 %v4887_v26  ;;  %v3378_v40 = vor.u32 %v4468_v30, %v3375_v32  ;;  %v4460_v63 = vld [vmem:[#allocation4 + $0x104] sm:$0xf]  ;;  %v3823_v30 = vld [vmem:[#allocation4 + $0x4d0] sm:$0xf0] }
  0xbf   :  { %v536_v37 = vpop.f32.mrf.mxu3  ;;  %2187 = vmatmul.bf16.vlgmr.msra.gmra.mxu1 %v4889_v31  ;;  %2277 = vmatpush.bf16.msra.mxu0 %v3330_v25  ;;  %v4436_v25 = vld [vmem:[#allocation4 + $0x44] sm:$0xf]  ;;  %v3346_v20 = vor.u32 %v4460_v63, %v3343_v0 }
  0xc0   :  { %v522_v35 = vpop.f32.mrf.mxu2  ;;  %v537_v41 = vadd.f32 %v536_v37, %v144_v22  ;;  %2291 = vmatpush.bf16.msra.mxu1 %v3458_v27  ;;  %v3247_v27 = vld [vmem:[#allocation4 + $0x50] sm:$0xf0]  ;;  %v4504_v37 = vld [vmem:[#allocation4 + $0x264] sm:$0xf] }
  0xc1   :  { %v523_v36 = vadd.f32 %v522_v35, %v143_v18  ;;  %v3266_v18 = vor.u32 %v4440_v12, %v3263_v13  ;;  %v3666_v35 = vor.u32 %v4540_v21, %v3663_v24  ;;  %v4616_v11 = vld [vmem:[#allocation4 + $0x5e4] sm:$0xf]  ;;  %v3967_v12 = vld [vmem:[#allocation4 + $0x5f0] sm:$0xf0]  ;;  %v148_v13 = vperm.slane %v4881_v2, 7 }
  0xc2   :  { %v606_v52 = vmax.f32 %v537_v41, 0.0  ;;  %v4432_v41 = vld [vmem:[#allocation4 + $0x24] sm:$0xf]  ;;  %v3970_v2 = vor.u32 %v4616_v11, %v3967_v12  ;;  %v3919_v12 = vld [vmem:[#allocation4 + $0x590] sm:$0xf0] }
  0xc3   :  { %v605_v48 = vmax.f32 %v523_v36, 0.0  ;;  %2278 = vmatpush.bf16.msra.mxu0 %v3314_v38  ;;  %v3250_v36 = vor.u32 %v4436_v25, %v3247_v27  ;;  %v3519_v38 = vld [vmem:[#allocation4 + $0x270] sm:$0xf0]  ;;  %v4528_v21 = vld [vmem:[#allocation4 + $0x324] sm:$0xf] }
  0xc4   :  { %v4895_v60 = vpack.c.bf16 %v606_v52, %v598_v51  ;;  %2292 = vmatpush.bf16.msra.mxu1 %v3442_v43  ;;  %v3231_v43 = vld [vmem:[#allocation4 + $0x30] sm:$0xf0]  ;;  %v3650_v52 = vor.u32 %v4536_v39, %v3647_v42  ;;  %v4612_v32 = vld [vmem:[#allocation4 + $0x5c4] sm:$0xf] }
  0xc5   :  { %v4893_v54 = vpack.c.bf16 %v605_v48, %v597_v47  ;;  %v3522_v48 = vor.u32 %v4504_v37, %v3519_v38  ;;  %v4492_v37 = vld [vmem:[#allocation4 + $0x204] sm:$0xf]  ;;  %v3471_v38 = vld [vmem:[#allocation4 + $0x210] sm:$0xf0] }
  0xc6   :  { %2215 = vmatmul.bf16.vlgmr.msra.gmra.mxu3 %v4895_v60  ;;  %v4524_v42 = vld [vmem:[#allocation4 + $0x304] sm:$0xf] }
  0xc7   :  { %2201 = vmatmul.bf16.vlgmr.msra.gmra.mxu2 %v4893_v54  ;;  %2319 = vmatpush.bf16.msra.mxu3 %v3714_v55  ;;  %v4532_v55 = vld [vmem:[#allocation4 + $0x344] sm:$0xf] }
  0xc8   :  { %2305 = vmatpush.bf16.msra.mxu2 %v3586_v53  ;;  %2279 = vmatpush.bf16.msra.mxu0 %v3298_v56  ;;  %v3234_v53 = vor.u32 %v4432_v41, %v3231_v43  ;;  %v3631_v56 = vld [vmem:[#allocation4 + $0x350] sm:$0xf0]  ;;  %v4648_v43 = vld [vmem:[#allocation4 + $0x6e4] sm:$0xf] }
  0xc9   :  { %2293 = vmatpush.bf16.msra.mxu1 %v3426_v61  ;;  %v3362_v61 = vor.u32 %v4464_v45, %v3359_v46  ;;  %v3634_v15 = vor.u32 %v4532_v55, %v3631_v56  ;;  %v3599_v41 = vld [vmem:[#allocation4 + $0x310] sm:$0xf0]  ;;  %v4604_v11 = vld [vmem:[#allocation4 + $0x584] sm:$0xf] }
  0xca   :  { %v4095_v46 = vld [vmem:[#allocation4 + $0x6f0] sm:$0xf0] }
  0xcb   :  { %2320 = vmatpush.bf16.msra.mxu3 %v3698_v5  ;;  %v4584_v5 = vld [vmem:[#allocation4 + $0x4e4] sm:$0xf]  ;;  %v3807_v55 = vld [vmem:[#allocation4 + $0x4b0] sm:$0xf0]  ;;  %v4098_v63 = vor.u32 %v4648_v43, %v4095_v46 }
  0xcc   :  { %2306 = vmatpush.bf16.msra.mxu2 %v3570_v4  ;;  %2280 = vmatpush.bf16.msra.mxu0 %v3282_v6  ;;  %v3839_v6 = vld [vmem:[#allocation4 + $0x4f0] sm:$0xf0]  ;;  %v4664_v46 = vld [vmem:[#allocation4 + $0x764] sm:$0xf] }
  0xcd   :  { %2294 = vmatpush.bf16.msra.mxu1 %v3410_v10  ;;  %v3506_v10 = vor.u32 %v4500_v49, %v3503_v50  ;;  %v3842_v24 = vor.u32 %v4584_v5, %v3839_v6  ;;  %v4079_v5 = vld [vmem:[#allocation4 + $0x6d0] sm:$0xf0]  ;;  %v4676_v6 = vld [vmem:[#allocation4 + $0x7c4] sm:$0xf] }
  0xce   :  { %v4031_v43 = vld [vmem:[#allocation4 + $0x670] sm:$0xf0] }
  0xcf   :  { %v548_v22 = vpop.f32.mrf.mxu0  ;;  %v562_v29 = vpop.f32.mrf.mxu1  ;;  %2321 = vmatpush.bf16.msra.mxu3 %v3682_v17  ;;  %v4496_v17 = vld [vmem:[#allocation4 + $0x224] sm:$0xf] }
  0xd0   :  { %2307 = vmatpush.bf16.msra.mxu2 %v3554_v16  ;;  %2281 = vmatpush.bf16.msra.mxu0 %v3266_v18  ;;  %v549_v44 = vadd.f32 %v548_v22, %v145_v28  ;;  %v563_v47 = vadd.f32 %v562_v29, %v146_v33  ;;  %v3218_v16 = vor.u32 %v4428_v57, %v3215_v62  ;;  %v3487_v18 = vld [vmem:[#allocation4 + $0x230] sm:$0xf0]  ;;  %v4580_v29 = vld [vmem:[#allocation4 + $0x4c4] sm:$0xf] }
  0xd1   :  { %2295 = vmatpush.bf16.msra.mxu1 %v3394_v23  ;;  %v3615_v22 = vld [vmem:[#allocation4 + $0x330] sm:$0xf0]  ;;  %v3826_v45 = vor.u32 %v4580_v29, %v3823_v30  ;;  %v4636_v29 = vld [vmem:[#allocation4 + $0x684] sm:$0xf] }
  0xd2   :  { %v599_v1 = vmax.f32 %v549_v44, 0.0  ;;  %v600_v7 = vmax.f32 %v563_v47, 0.0  ;;  %v4680_v47 = vld [vmem:[#allocation4 + $0x7e4] sm:$0xf]  ;;  %v4047_v30 = vld [vmem:[#allocation4 + $0x690] sm:$0xf0] }
  0xd3   :  { %2322 = vmatpush.bf16.msra.mxu3 %v3666_v35  ;;  %v3618_v35 = vor.u32 %v4528_v21, %v3615_v22  ;;  %v4568_v21 = vld [vmem:[#allocation4 + $0x464] sm:$0xf]  ;;  %v3775_v22 = vld [vmem:[#allocation4 + $0x470] sm:$0xf0] }
  0xd4   :  { %2308 = vmatpush.bf16.msra.mxu2 %v3538_v34  ;;  %2282 = vmatpush.bf16.msra.mxu0 %v3250_v36  ;;  %v3951_v36 = vld [vmem:[#allocation4 + $0x5d0] sm:$0xf0] }
  0xd5   :  { %2296 = vmatpush.bf16.msra.mxu1 %v3378_v40 }
  0xd7   :  { %v576_v51 = vpop.f32.mrf.mxu2  ;;  %v590_v58 = vpop.f32.mrf.mxu3  ;;  %2323 = vmatpush.bf16.msra.mxu3 %v3650_v52  ;;  %v3474_v52 = vor.u32 %v4492_v37, %v3471_v38  ;;  %v3759_v37 = vld [vmem:[#allocation4 + $0x450] sm:$0xf0]  ;;  %v4596_v38 = vld [vmem:[#allocation4 + $0x544] sm:$0xf] }
  0xd8   :  { %v550_v59 = vpop.f32.mrf.mxu0  ;;  %v564_v4 = vpop.f32.mrf.mxu1  ;;  %2309 = vmatpush.bf16.msra.mxu2 %v3522_v48  ;;  %2283 = vmatpush.bf16.msra.mxu0 %v3234_v53  ;;  %v577_v25 = vadd.f32 %v576_v51, %v147_v8  ;;  %v4223_v48 = vld [vmem:[#allocation4 + $0x7f0] sm:$0xf0]  ;;  %v3954_v51 = vor.u32 %v4612_v32, %v3951_v36  ;;  %v4576_v53 = vld [vmem:[#allocation4 + $0x4a4] sm:$0xf]  ;;  %v3778_v32 = vor.u32 %v4568_v21, %v3775_v22  ;;  %v4455_v21 = vld [vmem:[#allocation4 + $0xd4] sm:$0xf0] }
  0xd9   :  { %v551_v3 = vadd.f32 %v550_v59, %v145_v28  ;;  %v565_v9 = vadd.f32 %v564_v4, %v146_v33  ;;  %2297 = vmatpush.bf16.msra.mxu1 %v3362_v61  ;;  %v3490_v28 = vor.u32 %v4496_v17, %v3487_v18  ;;  %v591_v33 = vadd.f32 %v590_v58, %v148_v13  ;;  %v4608_v59 = vld [vmem:[#allocation4 + $0x5a4] sm:$0xf]  ;;  %v3935_v61 = vld [vmem:[#allocation4 + $0x5b0] sm:$0xf0]  ;;  %v3445_v22 = vld [vmem:[#allocation4 + $0x1c8] sm:$0xf] }
  0xda   :  { %v601_v49 = vmax.f32 %v577_v25, 0.0  ;;  %v3602_v58 = vor.u32 %v4524_v42, %v3599_v41  ;;  %v4644_v4 = vld [vmem:[#allocation4 + $0x6c4] sm:$0xf]  ;;  %v4063_v17 = vld [vmem:[#allocation4 + $0x6b0] sm:$0xf0]  ;;  %v3922_v18 = vor.u32 %v4604_v11, %v3919_v12 }
  0xdb   :  { %v607_v14 = vmax.f32 %v551_v3, 0.0  ;;  %v608_v19 = vmax.f32 %v565_v9, 0.0  ;;  %2324 = vmatpush.bf16.msra.mxu3 %v3634_v15  ;;  %v602_v56 = vmax.f32 %v591_v33, 0.0  ;;  %v3810_v3 = vor.u32 %v4576_v53, %v3807_v55  ;;  %v4572_v9 = vld [vmem:[#allocation4 + $0x484] sm:$0xf] }
  0xdc   :  { %2310 = vmatpush.bf16.msra.mxu2 %v3506_v10  ;;  %2284 = vmatpush.bf16.msra.mxu0 %v3218_v16  ;;  %v3791_v10 = vld [vmem:[#allocation4 + $0x490] sm:$0xf0]  ;;  %v4640_v16 = vld [vmem:[#allocation4 + $0x6a4] sm:$0xf] }
  0xdd   :  { %v4903_v23 = vpack.c.bf16 %v607_v14, %v599_v1  ;;  %v4905_v27 = vpack.c.bf16 %v608_v19, %v600_v7  ;;  %2298 = vmatpush.bf16.msra.mxu1 %v3346_v20  ;;  %v4226_v1 = vor.u32 %v4680_v47, %v4223_v48  ;;  %v3938_v7 = vor.u32 %v4608_v59, %v3935_v61  ;;  %v4672_v19 = vld [vmem:[#allocation4 + $0x7a4] sm:$0xf]  ;;  %v4191_v20 = vld [vmem:[#allocation4 + $0x7b0] sm:$0xf0] }
  0xde   :  { %v3794_v15 = vor.u32 %v4572_v9, %v3791_v10  ;;  %v3903_v25 = vld [vmem:[#allocation4 + $0x570] sm:$0xf0]  ;;  %v4564_v36 = vld [vmem:[#allocation4 + $0x444] sm:$0xf]  ;;  %v4491_v9 = vld [vmem:[#allocation4 + $0x1f4] sm:$0xf0] }
  0xdf   :  { %v578_v34 = vpop.f32.mrf.mxu2  ;;  %v592_v40 = vpop.f32.mrf.mxu3  ;;  %2229 = vmatmul.bf16.vlgmr.msrb.gmra.mxu0 %v4903_v23  ;;  %2243 = vmatmul.bf16.vlgmr.msrb.gmra.mxu1 %v4905_v27  ;;  %v4632_v41 = vld [vmem:[#allocation4 + $0x664] sm:$0xf]  ;;  %v4159_v47 = vld [vmem:[#allocation4 + $0x770] sm:$0xf0] }
  0xe0   :  { %v579_v39 = vadd.f32 %v578_v34, %v147_v8  ;;  %v593_v44 = vadd.f32 %v592_v40, %v148_v13  ;;  %2333 = vmatpush.bf16.msrb.mxu0 %v3842_v24  ;;  %2311 = vmatpush.bf16.msra.mxu2 %v3490_v28  ;;  %v4207_v8 = vld [vmem:[#allocation4 + $0x7d0] sm:$0xf0]  ;;  %v4082_v13 = vor.u32 %v4644_v4, %v4079_v5  ;;  %v4600_v24 = vld [vmem:[#allocation4 + $0x564] sm:$0xf]  ;;  %v3333_v5 = vld [vmem:[#allocation4 + $0xe8] sm:$0xf] }
  0xe1   :  { %2347 = vmatpush.bf16.msrb.mxu1 %v3970_v2  ;;  %2325 = vmatpush.bf16.msra.mxu3 %v3618_v35  ;;  %v4210_v14 = vor.u32 %v4676_v6, %v4207_v8  ;;  %v4066_v2 = vor.u32 %v4640_v16, %v4063_v17  ;;  %v4194_v28 = vor.u32 %v4672_v19, %v4191_v20  ;;  %v4668_v34 = vld [vmem:[#allocation4 + $0x784] sm:$0xf]  ;;  %v4175_v35 = vld [vmem:[#allocation4 + $0x790] sm:$0xf0]  ;;  %v3461_v8 = vld [vmem:[#allocation4 + $0x1e8] sm:$0xf] }
  0xe2   :  { %v609_v50 = vmax.f32 %v579_v39, 0.0  ;;  %v610_v57 = vmax.f32 %v593_v44, 0.0  ;;  %v3906_v33 = vor.u32 %v4600_v24, %v3903_v25  ;;  %v3887_v39 = vld [vmem:[#allocation4 + $0x550] sm:$0xf0]  ;;  %v4050_v40 = vor.u32 %v4636_v29, %v4047_v30  ;;  %v4560_v48 = vld [vmem:[#allocation4 + $0x424] sm:$0xf] }
  0xe3   :  { %v4178_v42 = vor.u32 %v4668_v34, %v4175_v35  ;;  %v3762_v44 = vor.u32 %v4564_v36, %v3759_v37  ;;  %v4162_v53 = vor.u32 %v4664_v46, %v4159_v47  ;;  %v4628_v55 = vld [vmem:[#allocation4 + $0x644] sm:$0xf]  ;;  %v4143_v61 = vld [vmem:[#allocation4 + $0x750] sm:$0xf0]  ;;  %v3317_v19 = vld [vmem:[#allocation4 + $0xc8] sm:$0xf] }
  0xe4   :  { %v4909_v62 = vpack.c.bf16 %v609_v50, %v601_v49  ;;  %v4911_v0 = vpack.c.bf16 %v610_v57, %v602_v56  ;;  %2334 = vmatpush.bf16.msrb.mxu0 %v3826_v45  ;;  %2312 = vmatpush.bf16.msra.mxu2 %v3474_v52  ;;  %v3890_v45 = vor.u32 %v4596_v38, %v3887_v39  ;;  %v3743_v49 = vld [vmem:[#allocation4 + $0x430] sm:$0xf0]  ;;  %v4592_v50 = vld [vmem:[#allocation4 + $0x524] sm:$0xf]  ;;  %v4487_v24 = vld [vmem:[#allocation4 + $0x1d4] sm:$0xf0] }
  0xe5   :  { %2348 = vmatpush.bf16.msrb.mxu1 %v3954_v51  ;;  %2326 = vmatpush.bf16.msra.mxu3 %v3602_v58  ;;  %v3871_v51 = vld [vmem:[#allocation4 + $0x530] sm:$0xf0]  ;;  %v4034_v52 = vor.u32 %v4632_v41, %v4031_v43  ;;  %v4660_v57 = vld [vmem:[#allocation4 + $0x744] sm:$0xf]  ;;  %v3746_v58 = vor.u32 %v4560_v48, %v3743_v49  ;;  %v3318_v34 = vor.u32 %v4455_v21, %v3317_v19  ;;  %v3717_v36 = vld [vmem:[#allocation4 + $0x3e8] sm:$0xf] }
  0xe6   :  { %2257 = vmatmul.bf16.vlgmr.msrb.gmra.mxu2 %v4909_v62  ;;  %2271 = vmatmul.bf16.vlgmr.msrb.gmra.mxu3 %v4911_v0  ;;  %v4015_v56 = vld [vmem:[#allocation4 + $0x650] sm:$0xf0]  ;;  %v3874_v59 = vor.u32 %v4592_v50, %v3871_v51  ;;  %v4146_v10 = vor.u32 %v4660_v57, %v4143_v61  ;;  %v4624_v11 = vld [vmem:[#allocation4 + $0x624] sm:$0xf]  ;;  %v3446_v35 = vor.u32 %v4487_v24, %v3445_v22  ;;  %v4555_v37 = vld [vmem:[#allocation4 + $0x3f4] sm:$0xf0] }
  0xe7   :  { %v3855_v4 = vld [vmem:[#allocation4 + $0x510] sm:$0xf0]  ;;  %v4018_v6 = vor.u32 %v4628_v55, %v4015_v56  ;;  %v4652_v29 = vld [vmem:[#allocation4 + $0x704] sm:$0xf]  ;;  %v3301_v38 = vld [vmem:[#allocation4 + $0xa8] sm:$0xf] }
  0xe8   :  { %2361 = vmatpush.bf16.msrb.mxu2 %v4098_v63  ;;  %2335 = vmatpush.bf16.msrb.mxu0 %v3810_v3  ;;  %v4556_v63 = vld [vmem:[#allocation4 + $0x404] sm:$0xf]  ;;  %v3999_v12 = vld [vmem:[#allocation4 + $0x630] sm:$0xf0]  ;;  %v4483_v41 = vld [vmem:[#allocation4 + $0x1b4] sm:$0xf0] }
  0xe9   :  { %2375 = vmatpush.bf16.msrb.mxu3 %v4226_v1  ;;  %2349 = vmatpush.bf16.msrb.mxu1 %v3938_v7  ;;  %v3727_v1 = vld [vmem:[#allocation4 + $0x410] sm:$0xf0]  ;;  %v4588_v3 = vld [vmem:[#allocation4 + $0x504] sm:$0xf]  ;;  %v4459_v7 = vld [vmem:[#allocation4 + $0xf4] sm:$0xf0]  ;;  %v4002_v20 = vor.u32 %v4624_v11, %v3999_v12 }
  0xea   :  { %v4127_v16 = vld [vmem:[#allocation4 + $0x730] sm:$0xf0]  ;;  %v3334_v17 = vor.u32 %v4459_v7, %v3333_v5  ;;  %v3573_v46 = vld [vmem:[#allocation4 + $0x2c8] sm:$0xf]  ;;  %v4519_v47 = vld [vmem:[#allocation4 + $0x2d4] sm:$0xf0] }
  0xeb   :  { %v4111_v30 = vld [vmem:[#allocation4 + $0x710] sm:$0xf0]  ;;  %v3701_v50 = vld [vmem:[#allocation4 + $0x3c8] sm:$0xf]  ;;  %v4551_v51 = vld [vmem:[#allocation4 + $0x3d4] sm:$0xf0]  ;;  %v3574_v57 = vor.u32 %v4519_v47, %v3573_v46 }
  0xec   :  { %2362 = vmatpush.bf16.msrb.mxu2 %v4082_v13  ;;  %2336 = vmatpush.bf16.msrb.mxu0 %v3794_v15  ;;  %v3730_v13 = vor.u32 %v4556_v63, %v3727_v1  ;;  %v4656_v15 = vld [vmem:[#allocation4 + $0x724] sm:$0xf]  ;;  %v4114_v43 = vor.u32 %v4652_v29, %v4111_v30  ;;  %v3413_v55 = vld [vmem:[#allocation4 + $0x188] sm:$0xf]  ;;  %v4479_v56 = vld [vmem:[#allocation4 + $0x194] sm:$0xf0] }
  0xed   :  { %2376 = vmatpush.bf16.msrb.mxu3 %v4210_v14  ;;  %2350 = vmatpush.bf16.msrb.mxu1 %v3922_v18  ;;  %v3858_v14 = vor.u32 %v4588_v3, %v3855_v4  ;;  %v3462_v18 = vor.u32 %v4491_v9, %v3461_v8  ;;  %v4130_v25 = vor.u32 %v4656_v15, %v4127_v16  ;;  %v4515_v61 = vld [vmem:[#allocation4 + $0x2b4] sm:$0xf0]  ;;  %v3685_v3 = vld [vmem:[#allocation4 + $0x3a8] sm:$0xf] }
  0xee   :  { %v3414_v1 = vor.u32 %v4479_v56, %v3413_v55  ;;  %v4547_v4 = vld [vmem:[#allocation4 + $0x3b4] sm:$0xf0]  ;;  %v3269_v5 = vld [vmem:[#allocation4 + $0x68] sm:$0xf] }
  0xef   :  { %2285 = vmatmul.bf16.vlgmr.msra.gmra.mxu0 %v4887_v26  ;;  %2299 = vmatmul.bf16.vlgmr.msra.gmra.mxu1 %v4889_v31  ;;  %v3397_v7 = vld [vmem:[#allocation4 + $0x168] sm:$0xf]  ;;  %v4475_v8 = vld [vmem:[#allocation4 + $0x174] sm:$0xf0] }
  0xf0   :  { %2363 = vmatpush.bf16.msrb.mxu2 %v4066_v2  ;;  %2337 = vmatpush.bf16.msrb.mxu0 %v3778_v32  ;;  %v4620_v2 = vld [vmem:[#allocation4 + $0x604] sm:$0xf]  ;;  %v3589_v32 = vld [vmem:[#allocation4 + $0x2e8] sm:$0xf]  ;;  %v4511_v12 = vld [vmem:[#allocation4 + $0x294] sm:$0xf0] }
  0xf1   :  { %2377 = vmatpush.bf16.msrb.mxu3 %v4194_v28  ;;  %2351 = vmatpush.bf16.msrb.mxu1 %v3906_v33  ;;  %v3983_v28 = vld [vmem:[#allocation4 + $0x610] sm:$0xf0]  ;;  %v4523_v33 = vld [vmem:[#allocation4 + $0x2f4] sm:$0xf0]  ;;  %v3541_v11 = vld [vmem:[#allocation4 + $0x288] sm:$0xf] }
  0xf2   :  { %v3986_v39 = vor.u32 %v4620_v2, %v3983_v28  ;;  %v3669_v15 = vld [vmem:[#allocation4 + $0x388] sm:$0xf]  ;;  %v4543_v16 = vld [vmem:[#allocation4 + $0x394] sm:$0xf0]  ;;  %v3542_v21 = vor.u32 %v4511_v12, %v3541_v11 }
  0xf3   :  { %v3381_v19 = vld [vmem:[#allocation4 + $0x148] sm:$0xf]  ;;  %v3670_v22 = vor.u32 %v4543_v16, %v3669_v15  ;;  %v4539_v30 = vld [vmem:[#allocation4 + $0x374] sm:$0xf0] }
  0xf4   :  { %2364 = vmatpush.bf16.msrb.mxu2 %v4050_v40  ;;  %2338 = vmatpush.bf16.msrb.mxu0 %v3762_v44  ;;  %v4451_v40 = vld [vmem:[#allocation4 + $0xb4] sm:$0xf0]  ;;  %v3590_v44 = vor.u32 %v4523_v33, %v3589_v32  ;;  %v3525_v24 = vld [vmem:[#allocation4 + $0x268] sm:$0xf] }
  0xf5   :  { %2378 = vmatpush.bf16.msrb.mxu3 %v4178_v42  ;;  %2352 = vmatpush.bf16.msrb.mxu1 %v3890_v45  ;;  %v3429_v42 = vld [vmem:[#allocation4 + $0x1a8] sm:$0xf]  ;;  %v3718_v45 = vor.u32 %v4555_v37, %v3717_v36  ;;  %v3302_v48 = vor.u32 %v4451_v40, %v3301_v38  ;;  %v4435_v33 = vld [vmem:[#allocation4 + $0x34] sm:$0xf0] }
  0xf6   :  { %2313 = vmatmul.bf16.vlgmr.msra.gmra.mxu2 %v4893_v54  ;;  %2327 = vmatmul.bf16.vlgmr.msra.gmra.mxu3 %v4895_v60  ;;  %v3430_v49 = vor.u32 %v4483_v41, %v3429_v42  ;;  %v3653_v29 = vld [vmem:[#allocation4 + $0x368] sm:$0xf]  ;;  %v4463_v47 = vld [vmem:[#allocation4 + $0x114] sm:$0xf0] }
  0xf7   :  { %v3237_v32 = vld [vmem:[#allocation4 + $0x28] sm:$0xf]  ;;  %v3654_v37 = vor.u32 %v4539_v30, %v3653_v29  ;;  %v4499_v56 = vld [vmem:[#allocation4 + $0x234] sm:$0xf0] }
  0xf8   :  { %2365 = vmatpush.bf16.msrb.mxu2 %v4034_v52  ;;  %2339 = vmatpush.bf16.msrb.mxu0 %v3746_v58  ;;  %v3285_v52 = vld [vmem:[#allocation4 + $0x88] sm:$0xf]  ;;  %v3702_v58 = vor.u32 %v4551_v51, %v3701_v50  ;;  %v3238_v42 = vor.u32 %v4435_v33, %v3237_v32  ;;  %v4587_v50 = vld [vmem:[#allocation4 + $0x4f4] sm:$0xf0] }
  0xf9   :  { %2379 = vmatpush.bf16.msrb.mxu3 %v4162_v53  ;;  %2353 = vmatpush.bf16.msrb.mxu1 %v3874_v59  ;;  %v4447_v53 = vld [vmem:[#allocation4 + $0x94] sm:$0xf0]  ;;  %v3557_v59 = vld [vmem:[#allocation4 + $0x2a8] sm:$0xf] }
  0xfa   :  { %v3286_v63 = vor.u32 %v4447_v53, %v3285_v52  ;;  %v3558_v9 = vor.u32 %v4515_v61, %v3557_v59  ;;  %v3509_v38 = vld [vmem:[#allocation4 + $0x248] sm:$0xf]  ;;  %v4619_v52 = vld [vmem:[#allocation4 + $0x5f4] sm:$0xf0] }
  0xfb   :  { %v3637_v40 = vld [vmem:[#allocation4 + $0x348] sm:$0xf]  ;;  %v4531_v61 = vld [vmem:[#allocation4 + $0x334] sm:$0xf0] }
  0xfc   :  { %2366 = vmatpush.bf16.msrb.mxu2 %v4018_v6  ;;  %2340 = vmatpush.bf16.msrb.mxu0 %v3730_v13  ;;  %v4443_v6 = vld [vmem:[#allocation4 + $0x74] sm:$0xf0]  ;;  %v3349_v46 = vld [vmem:[#allocation4 + $0x108] sm:$0xf] }
  0xfd   :  { %2380 = vmatpush.bf16.msrb.mxu3 %v4146_v10  ;;  %2354 = vmatpush.bf16.msrb.mxu1 %v3858_v14  ;;  %v3686_v10 = vor.u32 %v4547_v4, %v3685_v3  ;;  %v3270_v13 = vor.u32 %v4443_v6, %v3269_v5  ;;  %v3398_v14 = vor.u32 %v4475_v8, %v3397_v7  ;;  %v3973_v51 = vld [vmem:[#allocation4 + $0x5e8] sm:$0xf]  ;;  %v4583_v5 = vld [vmem:[#allocation4 + $0x4d4] sm:$0xf0] }
  0xfe   :  { %v3493_v55 = vld [vmem:[#allocation4 + $0x228] sm:$0xf]  ;;  %v4615_v7 = vld [vmem:[#allocation4 + $0x5d4] sm:$0xf0] }
  0xff   :  { %2341 = vmatmul.bf16.vlgmr.msrb.gmra.mxu0 %v4903_v23  ;;  %v3621_v59 = vld [vmem:[#allocation4 + $0x328] sm:$0xf]  ;;  %v3494_v4 = vor.u32 %v4499_v56, %v3493_v55  ;;  %v4527_v12 = vld [vmem:[#allocation4 + $0x314] sm:$0xf0] }
 0x100   :  { %2389 = vmatpush.bf16.msra.mxu0 %v3334_v17  ;;  %2367 = vmatpush.bf16.msrb.mxu2 %v4002_v20  ;;  %v3253_v17 = vld [vmem:[#allocation4 + $0x48] sm:$0xf]  ;;  %v4471_v20 = vld [vmem:[#allocation4 + $0x154] sm:$0xf0]  ;;  %v3622_v8 = vor.u32 %v4531_v61, %v3621_v59 }
 0x101   :  { %2403 = vmatpush.bf16.msra.mxu1 %v3462_v18  ;;  %2381 = vmatpush.bf16.msrb.mxu3 %v4130_v25  ;;  %v4439_v18 = vld [vmem:[#allocation4 + $0x54] sm:$0xf0]  ;;  %v3382_v28 = vor.u32 %v4471_v20, %v3381_v19  ;;  %v3829_v3 = vld [vmem:[#allocation4 + $0x4c8] sm:$0xf] }
 0x102   :  { %2355 = vmatmul.bf16.vlgmr.msrb.gmra.mxu1 %v4905_v27  ;;  %v4507_v25 = vld [vmem:[#allocation4 + $0x274] sm:$0xf0]  ;;  %v3254_v2 = vor.u32 %v4439_v18, %v3253_v17  ;;  %v3957_v6 = vld [vmem:[#allocation4 + $0x5c8] sm:$0xf]  ;;  %v3830_v15 = vor.u32 %v4583_v5, %v3829_v3 }
 0x103   :  { %v3526_v36 = vor.u32 %v4507_v25, %v3525_v24  ;;  %v3605_v11 = vld [vmem:[#allocation4 + $0x308] sm:$0xf]  ;;  %v3958_v16 = vor.u32 %v4615_v7, %v3957_v6  ;;  %v4683_v18 = vld [vmem:[#allocation4 + $0x7f4] sm:$0xf0] }
 0x104   :  { %2390 = vmatpush.bf16.msra.mxu0 %v3318_v34  ;;  %2368 = vmatpush.bf16.msrb.mxu2 %v3986_v39  ;;  %v3365_v34 = vld [vmem:[#allocation4 + $0x128] sm:$0xf]  ;;  %v4503_v39 = vld [vmem:[#allocation4 + $0x254] sm:$0xf0] }
 0x105   :  { %2404 = vmatpush.bf16.msra.mxu1 %v3446_v35  ;;  %2382 = vmatpush.bf16.msrb.mxu3 %v4114_v43  ;;  %v4467_v35 = vld [vmem:[#allocation4 + $0x134] sm:$0xf0]  ;;  %v4229_v17 = vld [vmem:[#allocation4 + $0x7e8] sm:$0xf] }
 0x106   :  { %v3366_v41 = vor.u32 %v4467_v35, %v3365_v34  ;;  %v4535_v43 = vld [vmem:[#allocation4 + $0x354] sm:$0xf0]  ;;  %v3813_v20 = vld [vmem:[#allocation4 + $0x4a8] sm:$0xf] }
 0x107   :  { %2369 = vmatmul.bf16.vlgmr.msrb.gmra.mxu2 %v4909_v62  ;;  %v3638_v53 = vor.u32 %v4535_v43, %v3637_v40  ;;  %v3941_v25 = vld [vmem:[#allocation4 + $0x5a8] sm:$0xf]  ;;  %v4647_v30 = vld [vmem:[#allocation4 + $0x6d4] sm:$0xf0] }
 0x108   :  { %2417 = vmatpush.bf16.msra.mxu2 %v3590_v44  ;;  %2391 = vmatpush.bf16.msra.mxu0 %v3302_v48  ;;  %v3221_v44 = vld [vmem:[#allocation4 + $0x8] sm:$0xf]  ;;  %v4679_v34 = vld [vmem:[#allocation4 + $0x7d4] sm:$0xf0] }
 0x109   :  { %2431 = vmatpush.bf16.msra.mxu3 %v3718_v45  ;;  %2405 = vmatpush.bf16.msra.mxu1 %v3430_v49  ;;  %v4431_v45 = vld [vmem:[#allocation4 + $0x14] sm:$0xf0]  ;;  %v3845_v48 = vld [vmem:[#allocation4 + $0x4e8] sm:$0xf]  ;;  %v3510_v49 = vor.u32 %v4503_v39, %v3509_v38 }
 0x10a   :  { %2383 = vmatmul.bf16.vlgmr.msrb.gmra.mxu3 %v4911_v0  ;;  %v4085_v29 = vld [vmem:[#allocation4 + $0x6c8] sm:$0xf]  ;;  %v4607_v40 = vld [vmem:[#allocation4 + $0x594] sm:$0xf0] }
 0x10b   :  { %v4213_v33 = vld [vmem:[#allocation4 + $0x7c8] sm:$0xf]  ;;  %v4086_v38 = vor.u32 %v4647_v30, %v4085_v29  ;;  %v4643_v43 = vld [vmem:[#allocation4 + $0x6b4] sm:$0xf0] }
 0x10c   :  { %2418 = vmatpush.bf16.msra.mxu2 %v3574_v57  ;;  %2392 = vmatpush.bf16.msra.mxu0 %v3286_v63  ;;  %v3222_v57 = vor.u32 %v4431_v45, %v3221_v44  ;;  %v3846_v63 = vor.u32 %v4587_v50, %v3845_v48  ;;  %v3925_v39 = vld [vmem:[#allocation4 + $0x588] sm:$0xf]  ;;  %v4639_v56 = vld [vmem:[#allocation4 + $0x694] sm:$0xf0] }
 0x10d   :  { %2432 = vmatpush.bf16.msra.mxu3 %v3702_v58  ;;  %2406 = vmatpush.bf16.msra.mxu1 %v3414_v1  ;;  %v3350_v58 = vor.u32 %v4463_v47, %v3349_v46  ;;  %v3974_v1 = vor.u32 %v4619_v52, %v3973_v51  ;;  %v4197_v45 = vld [vmem:[#allocation4 + $0x7a8] sm:$0xf]  ;;  %v4675_v46 = vld [vmem:[#allocation4 + $0x7b4] sm:$0xf0]  ;;  %v3926_v47 = vor.u32 %v4607_v40, %v3925_v39 }
 0x10e   :  { %v3781_v48 = vld [vmem:[#allocation4 + $0x468] sm:$0xf]  ;;  %v4603_v52 = vld [vmem:[#allocation4 + $0x574] sm:$0xf0] }
 0x10f   :  { %v3909_v51 = vld [vmem:[#allocation4 + $0x568] sm:$0xf]  ;;  %v4671_v59 = vld [vmem:[#allocation4 + $0x794] sm:$0xf0] }
 0x110   :  { %2419 = vmatpush.bf16.msra.mxu2 %v3558_v9  ;;  %2393 = vmatpush.bf16.msra.mxu0 %v3270_v13  ;;  %v3477_v9 = vld [vmem:[#allocation4 + $0x208] sm:$0xf]  ;;  %v3910_v61 = vor.u32 %v4603_v52, %v3909_v51  ;;  %v4599_v5 = vld [vmem:[#allocation4 + $0x554] sm:$0xf0] }
 0x111   :  { %2433 = vmatpush.bf16.msra.mxu3 %v3686_v10  ;;  %2407 = vmatpush.bf16.msra.mxu1 %v3398_v14  ;;  %v4495_v10 = vld [vmem:[#allocation4 + $0x214] sm:$0xf0]  ;;  %v4101_v13 = vld [vmem:[#allocation4 + $0x6e8] sm:$0xf] }
 0x112   :  { %v4651_v14 = vld [vmem:[#allocation4 + $0x6f4] sm:$0xf0]  ;;  %v3478_v19 = vor.u32 %v4495_v10, %v3477_v9  ;;  %v4053_v55 = vld [vmem:[#allocation4 + $0x688] sm:$0xf] }
 0x113   :  { %v4102_v24 = vor.u32 %v4651_v14, %v4101_v13  ;;  %v4054_v3 = vor.u32 %v4639_v56, %v4053_v55  ;;  %v4037_v7 = vld [vmem:[#allocation4 + $0x668] sm:$0xf]  ;;  %v4563_v14 = vld [vmem:[#allocation4 + $0x434] sm:$0xf0] }
 0x114   :  { %2420 = vmatpush.bf16.msra.mxu2 %v3542_v21  ;;  %2394 = vmatpush.bf16.msra.mxu0 %v3254_v2  ;;  %v4579_v21 = vld [vmem:[#allocation4 + $0x4b4] sm:$0xf0]  ;;  %v4165_v10 = vld [vmem:[#allocation4 + $0x768] sm:$0xf] }
 0x115   :  { %2434 = vmatpush.bf16.msra.mxu3 %v3670_v22  ;;  %2408 = vmatpush.bf16.msra.mxu1 %v3382_v28  ;;  %v3606_v22 = vor.u32 %v4527_v12, %v3605_v11  ;;  %v4611_v2 = vld [vmem:[#allocation4 + $0x5b4] sm:$0xf0]  ;;  %v4230_v28 = vor.u32 %v4683_v18, %v4229_v17  ;;  %v3814_v32 = vor.u32 %v4579_v21, %v3813_v20  ;;  %v3749_v13 = vld [vmem:[#allocation4 + $0x428] sm:$0xf] }
 0x116   :  { %v3942_v35 = vor.u32 %v4611_v2, %v3941_v25  ;;  %v4667_v11 = vld [vmem:[#allocation4 + $0x774] sm:$0xf0]  ;;  %v3750_v21 = vor.u32 %v4563_v14, %v3749_v13  ;;  %v3733_v25 = vld [vmem:[#allocation4 + $0x408] sm:$0xf]  ;;  %v4549_v14 = vld [vmem:[#allocation4 + $0x3cc] sm:$0xf] }
 0x117   :  { %v4595_v17 = vld [vmem:[#allocation4 + $0x534] sm:$0xf0]  ;;  %v4166_v18 = vor.u32 %v4667_v11, %v4165_v10  ;;  %v3861_v29 = vld [vmem:[#allocation4 + $0x508] sm:$0xf]  ;;  %v4517_v11 = vld [vmem:[#allocation4 + $0x2cc] sm:$0xf] }
 0x118   :  { %2421 = vmatpush.bf16.msra.mxu2 %v3526_v36  ;;  %2395 = vmatpush.bf16.msra.mxu0 %v3238_v42  ;;  %v3797_v36 = vld [vmem:[#allocation4 + $0x488] sm:$0xf]  ;;  %v4214_v42 = vor.u32 %v4679_v34, %v4213_v33  ;;  %v4631_v20 = vld [vmem:[#allocation4 + $0x654] sm:$0xf0]  ;;  %v4457_v33 = vld [vmem:[#allocation4 + $0xec] sm:$0xf] }
 0x119   :  { %2435 = vmatpush.bf16.msra.mxu3 %v3654_v37  ;;  %2409 = vmatpush.bf16.msra.mxu1 %v3366_v41  ;;  %v4575_v37 = vld [vmem:[#allocation4 + $0x494] sm:$0xf0]  ;;  %v4069_v41 = vld [vmem:[#allocation4 + $0x6a8] sm:$0xf]  ;;  %v3335_v34 = vld [vmem:[#allocation4 + $0xf8] sm:$0xf0] }
 0x11a   :  { %v3798_v44 = vor.u32 %v4575_v37, %v3797_v36  ;;  %v4070_v50 = vor.u32 %v4643_v43, %v4069_v41  ;;  %v4591_v30 = vld [vmem:[#allocation4 + $0x514] sm:$0xf0]  ;;  %v3463_v37 = vld [vmem:[#allocation4 + $0x1f8] sm:$0xf0]  ;;  %v3989_v52 = vld [vmem:[#allocation4 + $0x608] sm:$0xf] }
 0x11b   :  { %v4627_v39 = vld [vmem:[#allocation4 + $0x634] sm:$0xf0]  ;;  %v3862_v43 = vor.u32 %v4591_v30, %v3861_v29  ;;  %v4117_v55 = vld [vmem:[#allocation4 + $0x708] sm:$0xf]  ;;  %v3687_v29 = vld [vmem:[#allocation4 + $0x3b8] sm:$0xf0] }
 0x11c   :  { %2422 = vmatpush.bf16.msra.mxu2 %v3510_v49  ;;  %2396 = vmatpush.bf16.msra.mxu0 %v3222_v57  ;;  %v4571_v49 = vld [vmem:[#allocation4 + $0x474] sm:$0xf0] }
 0x11d   :  { %2436 = vmatpush.bf16.msra.mxu3 %v3638_v53  ;;  %2410 = vmatpush.bf16.msra.mxu1 %v3350_v58  ;;  %v4198_v53 = vor.u32 %v4675_v46, %v4197_v45  ;;  %v3782_v57 = vor.u32 %v4571_v49, %v3781_v48  ;;  %v4181_v58 = vld [vmem:[#allocation4 + $0x788] sm:$0xf]  ;;  %v4659_v41 = vld [vmem:[#allocation4 + $0x734] sm:$0xf0]  ;;  %v4453_v45 = vld [vmem:[#allocation4 + $0xcc] sm:$0xf] }
 0x11e   :  { %v4182_v6 = vor.u32 %v4671_v59, %v4181_v58  ;;  %v3319_v48 = vld [vmem:[#allocation4 + $0xd8] sm:$0xf0]  ;;  %v4485_v49 = vld [vmem:[#allocation4 + $0x1cc] sm:$0xf]  ;;  %v4655_v56 = vld [vmem:[#allocation4 + $0x714] sm:$0xf0] }
 0x11f   :  { %2397 = vmatmul.bf16.vlgmr.msra.gmra.mxu0 %v4887_v26  ;;  %v3591_v58 = vld [vmem:[#allocation4 + $0x2f8] sm:$0xf0]  ;;  %v3322_v59 = vor.u32 %v4453_v45, %v3319_v48 }
 0x120   :  { %2445 = vmatpush.bf16.msrb.mxu0 %v3846_v63  ;;  %2423 = vmatpush.bf16.msra.mxu2 %v3494_v4  ;;  %v3765_v63 = vld [vmem:[#allocation4 + $0x448] sm:$0xf]  ;;  %v3255_v45 = vld [vmem:[#allocation4 + $0x58] sm:$0xf0] }
 0x121   :  { %2459 = vmatpush.bf16.msrb.mxu1 %v3974_v1  ;;  %2437 = vmatpush.bf16.msra.mxu3 %v3622_v8  ;;  %v4567_v1 = vld [vmem:[#allocation4 + $0x454] sm:$0xf0]  ;;  %v3893_v4 = vld [vmem:[#allocation4 + $0x548] sm:$0xf]  ;;  %v3383_v48 = vld [vmem:[#allocation4 + $0x158] sm:$0xf0] }
 0x122   :  { %2411 = vmatmul.bf16.vlgmr.msra.gmra.mxu1 %v4889_v31  ;;  %v4635_v8 = vld [vmem:[#allocation4 + $0x674] sm:$0xf0]  ;;  %v3766_v9 = vor.u32 %v4567_v1, %v3765_v63  ;;  %v3894_v12 = vor.u32 %v4599_v5, %v3893_v4  ;;  %v3719_v63 = vld [vmem:[#allocation4 + $0x3f8] sm:$0xf0]  ;;  %v4449_v4 = vld [vmem:[#allocation4 + $0xac] sm:$0xf] }
 0x123   :  { %v3303_v5 = vld [vmem:[#allocation4 + $0xb8] sm:$0xf0] }
 0x124   :  { %2446 = vmatpush.bf16.msrb.mxu0 %v3830_v15  ;;  %2424 = vmatpush.bf16.msra.mxu2 %v3478_v19  ;;  %v4038_v15 = vor.u32 %v4635_v8, %v4037_v7  ;;  %v4021_v19 = vld [vmem:[#allocation4 + $0x648] sm:$0xf]  ;;  %v4481_v8 = vld [vmem:[#allocation4 + $0x1ac] sm:$0xf]  ;;  %v3306_v13 = vor.u32 %v4449_v4, %v3303_v5  ;;  %v3511_v5 = vld [vmem:[#allocation4 + $0x258] sm:$0xf0] }
 0x125   :  { %2460 = vmatpush.bf16.msrb.mxu1 %v3958_v16  ;;  %2438 = vmatpush.bf16.msra.mxu3 %v3606_v22  ;;  %v3877_v16 = vld [vmem:[#allocation4 + $0x528] sm:$0xf]  ;;  %v4501_v4 = vld [vmem:[#allocation4 + $0x24c] sm:$0xf] }
 0x126   :  { %v4149_v22 = vld [vmem:[#allocation4 + $0x748] sm:$0xf]  ;;  %v3878_v2 = vor.u32 %v4595_v17, %v3877_v16  ;;  %v4445_v17 = vld [vmem:[#allocation4 + $0x8c] sm:$0xf] }
 0x127   :  { %2425 = vmatmul.bf16.vlgmr.msra.gmra.mxu2 %v4893_v54 }
 0x128   :  { %2473 = vmatpush.bf16.msrb.mxu2 %v4102_v24  ;;  %2447 = vmatpush.bf16.msrb.mxu0 %v3814_v32  ;;  %v4663_v24 = vld [vmem:[#allocation4 + $0x754] sm:$0xf0]  ;;  %v4022_v32 = vor.u32 %v4631_v20, %v4021_v19  ;;  %v4477_v20 = vld [vmem:[#allocation4 + $0x18c] sm:$0xf] }
 0x129   :  { %2487 = vmatpush.bf16.msrb.mxu3 %v4230_v28  ;;  %2461 = vmatpush.bf16.msrb.mxu1 %v3942_v35  ;;  %v4559_v28 = vld [vmem:[#allocation4 + $0x414] sm:$0xf0]  ;;  %v4489_v35 = vld [vmem:[#allocation4 + $0x1ec] sm:$0xf]  ;;  %v4150_v36 = vor.u32 %v4663_v24, %v4149_v22 }
 0x12a   :  { %2439 = vmatmul.bf16.vlgmr.msra.gmra.mxu3 %v4895_v60  ;;  %v3734_v40 = vor.u32 %v4559_v28, %v3733_v25  ;;  %v3466_v46 = vor.u32 %v4489_v35, %v3463_v37  ;;  %v4513_v24 = vld [vmem:[#allocation4 + $0x2ac] sm:$0xf]  ;;  %v3559_v25 = vld [vmem:[#allocation4 + $0x2b8] sm:$0xf0] }
 0x12b   :  { %v4545_v28 = vld [vmem:[#allocation4 + $0x3ac] sm:$0xf] }
 0x12c   :  { %2474 = vmatpush.bf16.msrb.mxu2 %v4086_v38  ;;  %2448 = vmatpush.bf16.msrb.mxu0 %v3798_v44  ;;  %v4005_v38 = vld [vmem:[#allocation4 + $0x628] sm:$0xf]  ;;  %v3338_v44 = vor.u32 %v4457_v33, %v3335_v34  ;;  %v3271_v33 = vld [vmem:[#allocation4 + $0x78] sm:$0xf0]  ;;  %v3562_v34 = vor.u32 %v4513_v24, %v3559_v25  ;;  %v4473_v35 = vld [vmem:[#allocation4 + $0x16c] sm:$0xf]  ;;  %v3690_v37 = vor.u32 %v4545_v28, %v3687_v29 }
 0x12d   :  { %2488 = vmatpush.bf16.msrb.mxu3 %v4214_v42  ;;  %2462 = vmatpush.bf16.msrb.mxu1 %v3926_v47  ;;  %v4133_v42 = vld [vmem:[#allocation4 + $0x728] sm:$0xf]  ;;  %v4006_v47 = vor.u32 %v4627_v39, %v4005_v38  ;;  %v4509_v38 = vld [vmem:[#allocation4 + $0x28c] sm:$0xf]  ;;  %v3543_v39 = vld [vmem:[#allocation4 + $0x298] sm:$0xf0] }
 0x12e   :  { %v4134_v51 = vor.u32 %v4659_v41, %v4133_v42  ;;  %v4541_v42 = vld [vmem:[#allocation4 + $0x38c] sm:$0xf]  ;;  %v3671_v41 = vld [vmem:[#allocation4 + $0x398] sm:$0xf0] }
 0x12f   :  { %v4529_v25 = vld [vmem:[#allocation4 + $0x32c] sm:$0xf] }
 0x130   :  { %2475 = vmatpush.bf16.msrb.mxu2 %v4070_v50  ;;  %2449 = vmatpush.bf16.msrb.mxu0 %v3782_v57  ;;  %v3447_v50 = vld [vmem:[#allocation4 + $0x1d8] sm:$0xf0]  ;;  %v4521_v57 = vld [vmem:[#allocation4 + $0x2ec] sm:$0xf] }
 0x131   :  { %2489 = vmatpush.bf16.msrb.mxu3 %v4198_v53  ;;  %2463 = vmatpush.bf16.msrb.mxu1 %v3910_v61  ;;  %v4623_v53 = vld [vmem:[#allocation4 + $0x614] sm:$0xf0]  ;;  %v4553_v61 = vld [vmem:[#allocation4 + $0x3ec] sm:$0xf]  ;;  %v3450_v1 = vor.u32 %v4485_v49, %v3447_v50  ;;  %v3594_v7 = vor.u32 %v4521_v57, %v3591_v58  ;;  %v3674_v49 = vor.u32 %v4541_v42, %v3671_v41  ;;  %v3239_v58 = vld [vmem:[#allocation4 + $0x38] sm:$0xf0] }
 0x132   :  { %v3722_v10 = vor.u32 %v4553_v61, %v3719_v63  ;;  %v4505_v50 = vld [vmem:[#allocation4 + $0x26c] sm:$0xf]  ;;  %v3607_v41 = vld [vmem:[#allocation4 + $0x318] sm:$0xf0] }
 0x133   :  { %v4433_v57 = vld [vmem:[#allocation4 + $0x2c] sm:$0xf] }
 0x134   :  { %2476 = vmatpush.bf16.msrb.mxu2 %v4054_v3  ;;  %2450 = vmatpush.bf16.msrb.mxu0 %v3766_v9  ;;  %v3990_v3 = vor.u32 %v4623_v53, %v3989_v52  ;;  %v3431_v9 = vld [vmem:[#allocation4 + $0x1b8] sm:$0xf0]  ;;  %v4537_v53 = vld [vmem:[#allocation4 + $0x36c] sm:$0xf] }
 0x135   :  { %2490 = vmatpush.bf16.msrb.mxu3 %v4182_v6  ;;  %2464 = vmatpush.bf16.msrb.mxu1 %v3894_v12  ;;  %v4118_v6 = vor.u32 %v4655_v56, %v4117_v55  ;;  %v3575_v12 = vld [vmem:[#allocation4 + $0x2d8] sm:$0xf0]  ;;  %v3434_v16 = vor.u32 %v4481_v8, %v3431_v9  ;;  %v4465_v63 = vld [vmem:[#allocation4 + $0x12c] sm:$0xf] }
 0x136   :  { %v3578_v19 = vor.u32 %v4517_v11, %v3575_v12  ;;  %v3655_v55 = vld [vmem:[#allocation4 + $0x378] sm:$0xf0]  ;;  %v4533_v8 = vld [vmem:[#allocation4 + $0x34c] sm:$0xf] }
 0x137   :  { %v3639_v9 = vld [vmem:[#allocation4 + $0x358] sm:$0xf0] }
 0x138   :  { %2477 = vmatpush.bf16.msrb.mxu2 %v4038_v15  ;;  %2451 = vmatpush.bf16.msrb.mxu0 %v3750_v21  ;;  %v3703_v15 = vld [vmem:[#allocation4 + $0x3d8] sm:$0xf0] }
 0x139   :  { %2491 = vmatpush.bf16.msrb.mxu3 %v4166_v18  ;;  %2465 = vmatpush.bf16.msrb.mxu1 %v3878_v2  ;;  %v3287_v18 = vld [vmem:[#allocation4 + $0x98] sm:$0xf0]  ;;  %v3706_v22 = vor.u32 %v4549_v14, %v3703_v15  ;;  %v3514_v15 = vor.u32 %v4501_v4, %v3511_v5  ;;  %v4677_v5 = vld [vmem:[#allocation4 + $0x7cc] sm:$0xf] }
 0x13a   :  { %v3415_v21 = vld [vmem:[#allocation4 + $0x198] sm:$0xf0]  ;;  %v3290_v2 = vor.u32 %v4445_v17, %v3287_v18  ;;  %v4617_v18 = vld [vmem:[#allocation4 + $0x5ec] sm:$0xf] }
 0x13b   :  { %v3418_v30 = vor.u32 %v4477_v20, %v3415_v21  ;;  %v3223_v12 = vld [vmem:[#allocation4 + $0x18] sm:$0xf0]  ;;  %v4497_v21 = vld [vmem:[#allocation4 + $0x22c] sm:$0xf] }
 0x13c   :  { %2478 = vmatpush.bf16.msrb.mxu2 %v4022_v32  ;;  %2452 = vmatpush.bf16.msrb.mxu0 %v3734_v40  ;;  %v4441_v32 = vld [vmem:[#allocation4 + $0x6c] sm:$0xf]  ;;  %v3351_v14 = vld [vmem:[#allocation4 + $0x118] sm:$0xf0] }
 0x13d   :  { %2492 = vmatpush.bf16.msrb.mxu3 %v4150_v36  ;;  %2466 = vmatpush.bf16.msrb.mxu1 %v3862_v43  ;;  %v3399_v36 = vld [vmem:[#allocation4 + $0x178] sm:$0xf0]  ;;  %v3274_v40 = vor.u32 %v4441_v32, %v3271_v33 }
 0x13e   :  { %v3402_v43 = vor.u32 %v4473_v35, %v3399_v36  ;;  %v3847_v17 = vld [vmem:[#allocation4 + $0x4f8] sm:$0xf0]  ;;  %v4613_v35 = vld [vmem:[#allocation4 + $0x5cc] sm:$0xf] }
 0x13f   :  { %2453 = vmatmul.bf16.vlgmr.msrb.gmra.mxu0 %v4903_v23  ;;  %v3975_v20 = vld [vmem:[#allocation4 + $0x5f8] sm:$0xf0] }
 0x140   :  { %2501 = vmatpush.bf16.msra.mxu0 %v3338_v44  ;;  %2479 = vmatpush.bf16.msrb.mxu2 %v4006_v47  ;;  %v4437_v44 = vld [vmem:[#allocation4 + $0x4c] sm:$0xf]  ;;  %v3978_v32 = vor.u32 %v4617_v18, %v3975_v20  ;;  %v3959_v36 = vld [vmem:[#allocation4 + $0x5d8] sm:$0xf0] }
 0x141   :  { %2515 = vmatpush.bf16.msra.mxu1 %v3466_v46  ;;  %2493 = vmatpush.bf16.msrb.mxu3 %v4134_v51  ;;  %v3546_v46 = vor.u32 %v4509_v38, %v3543_v39  ;;  %v4469_v47 = vld [vmem:[#allocation4 + $0x14c] sm:$0xf]  ;;  %v3527_v51 = vld [vmem:[#allocation4 + $0x278] sm:$0xf0]  ;;  %v3258_v52 = vor.u32 %v4437_v44, %v3255_v45 }
 0x142   :  { %2467 = vmatmul.bf16.vlgmr.msrb.gmra.mxu1 %v4905_v27  ;;  %v3386_v56 = vor.u32 %v4469_v47, %v3383_v48  ;;  %v3530_v61 = vor.u32 %v4505_v50, %v3527_v51  ;;  %v4493_v38 = vld [vmem:[#allocation4 + $0x20c] sm:$0xf]  ;;  %v3479_v39 = vld [vmem:[#allocation4 + $0x218] sm:$0xf0] }
 0x143   :  { %v4103_v44 = vld [vmem:[#allocation4 + $0x6f8] sm:$0xf0]  ;;  %v3482_v50 = vor.u32 %v4493_v38, %v3479_v39  ;;  %v4577_v51 = vld [vmem:[#allocation4 + $0x4ac] sm:$0xf] }
 0x144   :  { %2502 = vmatpush.bf16.msra.mxu0 %v3322_v59  ;;  %2480 = vmatpush.bf16.msrb.mxu2 %v3990_v3  ;;  %v4931_v59 = vpop.f32.mrf.mxu0  ;;  %v3658_v3 = vor.u32 %v4537_v53, %v3655_v55  ;;  %v4231_v47 = vld [vmem:[#allocation4 + $0x7f8] sm:$0xf0]  ;;  %v4597_v39 = vld [vmem:[#allocation4 + $0x54c] sm:$0xf] }
 0x145   :  { %2516 = vmatpush.bf16.msra.mxu1 %v3450_v1  ;;  %2494 = vmatpush.bf16.msrb.mxu3 %v4118_v6  ;;  %v3367_v1 = vld [vmem:[#allocation4 + $0x138] sm:$0xf0]  ;;  %v4933_v6 = vpop.f32.mrf.mxu1 }
 0x146   :  { %v3370_v11 = vor.u32 %v4465_v63, %v3367_v1  ;;  %v4645_v1 = vld [vmem:[#allocation4 + $0x6cc] sm:$0xf]  ;;  %v4199_v18 = vld [vmem:[#allocation4 + $0x7b8] sm:$0xf0] }
 0x147   :  { %2481 = vmatmul.bf16.vlgmr.msrb.gmra.mxu2 %v4909_v62 }
 0x148   :  { %2529 = vmatpush.bf16.msra.mxu2 %v3594_v7  ;;  %2503 = vmatpush.bf16.msra.mxu0 %v3306_v13  ;;  %v3242_v7 = vor.u32 %v4433_v57, %v3239_v58  ;;  %v4461_v13 = vld [vmem:[#allocation4 + $0x10c] sm:$0xf]  ;;  %v3943_v58 = vld [vmem:[#allocation4 + $0x5b8] sm:$0xf0] }
 0x149   :  { %2543 = vmatpush.bf16.msra.mxu3 %v3722_v10  ;;  %2517 = vmatpush.bf16.msra.mxu1 %v3434_v16  ;;  %v4429_v10 = vld [vmem:[#allocation4 + $0xc] sm:$0xf]  ;;  %v3354_v28 = vor.u32 %v4461_v13, %v3351_v14 }
 0x14a   :  { %2495 = vmatmul.bf16.vlgmr.msrb.gmra.mxu3 %v4911_v0  ;;  %v4585_v16 = vld [vmem:[#allocation4 + $0x4ec] sm:$0xf]  ;;  %v3226_v24 = vor.u32 %v4429_v10, %v3223_v12  ;;  %v4939_v53 = vpop.f32.mrf.mxu2  ;;  %v3927_v12 = vld [vmem:[#allocation4 + $0x598] sm:$0xf0] }
 0x14b   :  { %v3850_v29 = vor.u32 %v4585_v16, %v3847_v17  ;;  %v4609_v57 = vld [vmem:[#allocation4 + $0x5ac] sm:$0xf] }
 0x14c   :  { %2530 = vmatpush.bf16.msra.mxu2 %v3578_v19  ;;  %2504 = vmatpush.bf16.msra.mxu0 %v3290_v2  ;;  %v3642_v19 = vor.u32 %v4533_v8, %v3639_v9  ;;  %v3623_v2 = vld [vmem:[#allocation4 + $0x338] sm:$0xf0]  ;;  %v4935_v42 = vpop.f32.mrf.mxu0  ;;  %v3946_v8 = vor.u32 %v4609_v57, %v3943_v58  ;;  %v4573_v9 = vld [vmem:[#allocation4 + $0x48c] sm:$0xf] }
 0x14d   :  { %2544 = vmatpush.bf16.msra.mxu3 %v3706_v22  ;;  %2518 = vmatpush.bf16.msra.mxu1 %v3418_v30  ;;  %v3495_v22 = vld [vmem:[#allocation4 + $0x238] sm:$0xf0]  ;;  %v4581_v30 = vld [vmem:[#allocation4 + $0x4cc] sm:$0xf]  ;;  %v4937_v48 = vpop.f32.mrf.mxu1 }
 0x14e   :  { %v3498_v33 = vor.u32 %v4497_v21, %v3495_v22  ;;  %v4641_v14 = vld [vmem:[#allocation4 + $0x6ac] sm:$0xf]  ;;  %v3783_v22 = vld [vmem:[#allocation4 + $0x478] sm:$0xf0] }
 0x14f   :  { %v4673_v17 = vld [vmem:[#allocation4 + $0x7ac] sm:$0xf]  ;;  %v3879_v57 = vld [vmem:[#allocation4 + $0x538] sm:$0xf0] }
 0x150   :  { %2531 = vmatpush.bf16.msra.mxu2 %v3562_v34  ;;  %2505 = vmatpush.bf16.msra.mxu0 %v3274_v40  ;;  %v3831_v34 = vld [vmem:[#allocation4 + $0x4d8] sm:$0xf0]  ;;  %v4525_v40 = vld [vmem:[#allocation4 + $0x30c] sm:$0xf] }
 0x151   :  { %2545 = vmatpush.bf16.msra.mxu3 %v3690_v37  ;;  %2519 = vmatpush.bf16.msra.mxu1 %v3402_v43  ;;  %v3626_v37 = vor.u32 %v4529_v25, %v3623_v2  ;;  %v4649_v43 = vld [vmem:[#allocation4 + $0x6ec] sm:$0xf]  ;;  %v3834_v45 = vor.u32 %v4581_v30, %v3831_v34  ;;  %v3610_v55 = vor.u32 %v4525_v40, %v3607_v41  ;;  %v3911_v2 = vld [vmem:[#allocation4 + $0x578] sm:$0xf0] }
 0x152   :  { %v4569_v21 = vld [vmem:[#allocation4 + $0x46c] sm:$0xf]  ;;  %v4951_v30 = vpop.f32.mrf.mxu2  ;;  %v3895_v40 = vld [vmem:[#allocation4 + $0x558] sm:$0xf0] }
 0x153   :  { %v4601_v25 = vld [vmem:[#allocation4 + $0x56c] sm:$0xf] }
 0x154   :  { %2532 = vmatpush.bf16.msra.mxu2 %v3546_v46  ;;  %2506 = vmatpush.bf16.msra.mxu0 %v3258_v52  ;;  %v4681_v46 = vld [vmem:[#allocation4 + $0x7ec] sm:$0xf]  ;;  %v3815_v52 = vld [vmem:[#allocation4 + $0x4b8] sm:$0xf0] }
 0x155   :  { %2546 = vmatpush.bf16.msra.mxu3 %v3674_v49  ;;  %2520 = vmatpush.bf16.msra.mxu1 %v3386_v56  ;;  %v3962_v49 = vor.u32 %v4613_v35, %v3959_v36  ;;  %v4106_v56 = vor.u32 %v4649_v43, %v4103_v44  ;;  %v4234_v63 = vor.u32 %v4681_v46, %v4231_v47  ;;  %v4565_v36 = vld [vmem:[#allocation4 + $0x44c] sm:$0xf] }
 0x156   :  { %v3818_v4 = vor.u32 %v4577_v51, %v3815_v52  ;;  %v3914_v35 = vor.u32 %v4601_v25, %v3911_v2  ;;  %v4633_v44 = vld [vmem:[#allocation4 + $0x66c] sm:$0xf]  ;;  %v3751_v52 = vld [vmem:[#allocation4 + $0x438] sm:$0xf0] }
 0x157   :  { %v4665_v47 = vld [vmem:[#allocation4 + $0x76c] sm:$0xf]  ;;  %v4691_v2 = vld [vmem:[#allocation6 + $0x38] sm:$0xff] }
 0x158   :  { %2533 = vmatpush.bf16.msra.mxu2 %v3530_v61  ;;  %2507 = vmatpush.bf16.msra.mxu0 %v3242_v7  ;;  %v4942_v61 = vpop.f32.mrf.mxu3  ;;  %v4215_v7 = vld [vmem:[#allocation4 + $0x7d8] sm:$0xf0]  ;;  %v4561_v51 = vld [vmem:[#allocation4 + $0x42c] sm:$0xf] }
 0x159   :  { %2547 = vmatpush.bf16.msra.mxu3 %v3658_v3  ;;  %2521 = vmatpush.bf16.msra.mxu1 %v3370_v11  ;;  %v4087_v3 = vld [vmem:[#allocation4 + $0x6d8] sm:$0xf0]  ;;  %v4605_v11 = vld [vmem:[#allocation4 + $0x58c] sm:$0xf] }
 0x15a   :  { %v4090_v10 = vor.u32 %v4645_v1, %v4087_v3  ;;  %v3930_v20 = vor.u32 %v4605_v11, %v3927_v12  ;;  %v4629_v1 = vld [vmem:[#allocation4 + $0x64c] sm:$0xf]  ;;  %v4023_v3 = vld [vmem:[#allocation4 + $0x658] sm:$0xf0] }
 0x15b   :  { %v3735_v11 = vld [vmem:[#allocation4 + $0x418] sm:$0xf0]  ;;  %v4026_v12 = vor.u32 %v4629_v1, %v4023_v3 }
 0x15c   :  { %2534 = vmatpush.bf16.msra.mxu2 %v3514_v15  ;;  %2508 = vmatpush.bf16.msra.mxu0 %v3226_v24  ;;  %v4945_v13 = vpop.f32.mrf.mxu0  ;;  %v4071_v15 = vld [vmem:[#allocation4 + $0x6b8] sm:$0xf0] }
 0x15d   :  { %2548 = vmatpush.bf16.msra.mxu3 %v3642_v19  ;;  %2522 = vmatpush.bf16.msra.mxu1 %v3354_v28  ;;  %v4949_v19 = vpop.f32.mrf.mxu1  ;;  %v4074_v24 = vor.u32 %v4641_v14, %v4071_v15  ;;  %v4202_v28 = vor.u32 %v4673_v17, %v4199_v18  ;;  %v3863_v14 = vld [vmem:[#allocation4 + $0x518] sm:$0xf0]  ;;  %v4966_v15 = vld [vmem:[%s5000_s4] sm:$0xf]  ;;  %v4625_v18 = vld [vmem:[#allocation4 + $0x62c] sm:$0xf] }
 0x15f   :  { %2509 = vmatmul.bf16.vlgmr.msra.gmra.mxu0 %v4887_v26  ;;  %v3799_v26 = vld [vmem:[#allocation4 + $0x498] sm:$0xf0] }
 0x160   :  { %2557 = vmatpush.bf16.msrb.mxu0 %v3850_v29  ;;  %2535 = vmatpush.bf16.msra.mxu2 %v3498_v33  ;;  %v3802_v16 = vor.u32 %v4573_v9, %v3799_v26  ;;  %v4637_v29 = vld [vmem:[#allocation4 + $0x68c] sm:$0xf]  ;;  %v4953_v34 = vpop.f32.mrf.mxu3 }
 0x161   :  { %2571 = vmatpush.bf16.msrb.mxu1 %v3978_v32  ;;  %2549 = vmatpush.bf16.msra.mxu3 %v3626_v37  ;;  %v3786_v32 = vor.u32 %v4569_v21, %v3783_v22  ;;  %v4669_v33 = vld [vmem:[#allocation4 + $0x78c] sm:$0xf]  ;;  %v3767_v37 = vld [vmem:[#allocation4 + $0x458] sm:$0xf0] }
 0x162   :  { %2523 = vmatmul.bf16.vlgmr.msra.gmra.mxu1 %v4889_v31  ;;  %v4218_v31 = vor.u32 %v4677_v5, %v4215_v7  ;;  %v3770_v46 = vor.u32 %v4565_v36, %v3767_v37  ;;  %v3754_v5 = vor.u32 %v4561_v51, %v3751_v52  ;;  %v4661_v7 = vld [vmem:[#allocation4 + $0x74c] sm:$0xf] }
 0x163   :  { %v4657_v22 = vld [vmem:[#allocation4 + $0x72c] sm:$0xf] }
 0x164   :  { %2558 = vmatpush.bf16.msrb.mxu0 %v3834_v45  ;;  %2536 = vmatpush.bf16.msra.mxu2 %v3482_v50  ;;  %v4955_v41 = vpop.f32.mrf.mxu0  ;;  %v4039_v45 = vld [vmem:[#allocation4 + $0x678] sm:$0xf0]  ;;  %v3898_v50 = vor.u32 %v4597_v39, %v3895_v40  ;;  %v4653_v37 = vld [vmem:[#allocation4 + $0x70c] sm:$0xf] }
 0x165   :  { %2572 = vmatpush.bf16.msrb.mxu1 %v3962_v49  ;;  %2550 = vmatpush.bf16.msra.mxu3 %v3610_v55  ;;  %v4167_v49 = vld [vmem:[#allocation4 + $0x778] sm:$0xf0]  ;;  %v4042_v55 = vor.u32 %v4633_v44, %v4039_v45  ;;  %v4957_v58 = vpop.f32.mrf.mxu1 }
 0x167   :  { %2537 = vmatmul.bf16.vlgmr.msra.gmra.mxu2 %v4893_v54  ;;  %v4055_v54 = vld [vmem:[#allocation4 + $0x698] sm:$0xf0] }
 0x168   :  { %2585 = vmatpush.bf16.msrb.mxu2 %v4106_v56  ;;  %2559 = vmatpush.bf16.msrb.mxu0 %v3818_v4  ;;  %v4058_v38 = vor.u32 %v4637_v29, %v4055_v54  ;;  %v4593_v56 = vld [vmem:[#allocation4 + $0x52c] sm:$0xf]  ;;  %v4699_v54 = vld [vmem:[#allocation6 + $0x78] sm:$0xff] }
 0x169   :  { %2599 = vmatpush.bf16.msrb.mxu3 %v4234_v63  ;;  %2573 = vmatpush.bf16.msrb.mxu1 %v3946_v8  ;;  %v4170_v63 = vor.u32 %v4665_v47, %v4167_v49  ;;  %v4959_v4 = vpop.f32.mrf.mxu2  ;;  %v4151_v8 = vld [vmem:[#allocation4 + $0x758] sm:$0xf0]  ;;  %v4961_v9 = vpop.f32.mrf.mxu3  ;;  %v3882_v26 = vor.u32 %v4593_v56, %v3879_v57 }
 0x16a   :  { %2551 = vmatmul.bf16.vlgmr.msra.gmra.mxu3 %v4895_v60  ;;  %v4183_v60 = vld [vmem:[#allocation4 + $0x798] sm:$0xf0]  ;;  %v4154_v17 = vor.u32 %v4661_v7, %v4151_v8 }
 0x16b   :  { %v4186_v43 = vor.u32 %v4669_v33, %v4183_v60  ;;  %v4621_v33 = vld [vmem:[#allocation4 + $0x60c] sm:$0xf]  ;;  %v3991_v60 = vld [vmem:[#allocation4 + $0x618] sm:$0xf0] }
 0x16c   :  { %2586 = vmatpush.bf16.msrb.mxu2 %v4090_v10  ;;  %2560 = vmatpush.bf16.msrb.mxu0 %v3802_v16  ;;  %v4557_v10 = vld [vmem:[#allocation4 + $0x40c] sm:$0xf]  ;;  %v2286_v16 = vpop.f32.mrf.mxu0  ;;  %v3994_v45 = vor.u32 %v4621_v33, %v3991_v60 }
 0x16d   :  { %2600 = vmatpush.bf16.msrb.mxu3 %v4218_v31  ;;  %2574 = vmatpush.bf16.msrb.mxu1 %v3930_v20  ;;  %v4589_v31 = vld [vmem:[#allocation4 + $0x50c] sm:$0xf]  ;;  %v4007_v20 = vld [vmem:[#allocation4 + $0x638] sm:$0xf0]  ;;  %v3738_v21 = vor.u32 %v4557_v10, %v3735_v11  ;;  %v2300_v39 = vpop.f32.mrf.mxu1 }
 0x16e   :  { %v3866_v25 = vor.u32 %v4589_v31, %v3863_v14  ;;  %v4010_v29 = vor.u32 %v4625_v18, %v4007_v20  ;;  %v4694_v14 = vld [vmem:[#allocation6 + $0x50] sm:$0xff]  ;;  %v4685_v20 = vld [vmem:[#allocation6 + $0x8] sm:$0xff] }
 0x170   :  { %2587 = vmatpush.bf16.msrb.mxu2 %v4074_v24  ;;  %2561 = vmatpush.bf16.msrb.mxu0 %v3786_v32  ;;  %v4135_v24 = vld [vmem:[#allocation4 + $0x738] sm:$0xf0] }
 0x171   :  { %2601 = vmatpush.bf16.msrb.mxu3 %v4202_v28  ;;  %2575 = vmatpush.bf16.msrb.mxu1 %v3914_v35  ;;  %v877_v28 = vperm.slane %v4966_v15, 0  ;;  %v4138_v32 = vor.u32 %v4657_v22, %v4135_v24  ;;  %v2260_v36 = vpop.f32.mrf.mxu2  ;;  %v2274_v40 = vpop.f32.mrf.mxu3 }
 0x173   :  { %v2177_v35 = vadd.f32 %v4935_v42, %v877_v28  ;;  %v2175_v44 = vadd.f32 %v4931_v59, %v877_v28  ;;  %v878_v59 = vperm.slane %v4966_v15, 1 }
 0x174   :  { %2588 = vmatpush.bf16.msrb.mxu2 %v4058_v38  ;;  %2562 = vmatpush.bf16.msrb.mxu0 %v3770_v46  ;;  %v4119_v38 = vld [vmem:[#allocation4 + $0x718] sm:$0xf0]  ;;  %v4698_v46 = vld [vmem:[#allocation6 + $0x70] sm:$0xff]  ;;  %v2288_v49 = vpop.f32.mrf.mxu0 }
 0x175   :  { %2602 = vmatpush.bf16.msrb.mxu3 %v4186_v43  ;;  %2576 = vmatpush.bf16.msrb.mxu1 %v3898_v50  ;;  %v4690_v43 = vld [vmem:[#allocation6 + $0x30] sm:$0xff]  ;;  %v4122_v47 = vor.u32 %v4653_v37, %v4119_v38  ;;  %v2191_v42 = vadd.f32 %v4937_v48, %v2177_v35  ;;  %v4689_v50 = vld [vmem:[#allocation6 + $0x28] sm:$0xff]  ;;  %v2189_v51 = vadd.f32 %v4933_v6, %v2175_v44  ;;  %v4696_v6 = vld [vmem:[#allocation6 + $0x60] sm:$0xff] }
 0x177   :  { %v2205_v52 = vadd.f32 %v4951_v30, %v2191_v42  ;;  %v2302_v30 = vpop.f32.mrf.mxu1  ;;  %v4706_v42 = vld [vmem:[#allocation6 + $0xb0] sm:$0xff] }
 0x178   :  { %2589 = vmatpush.bf16.msrb.mxu2 %v4042_v55  ;;  %2563 = vmatpush.bf16.msrb.mxu0 %v3754_v5  ;;  %v4697_v55 = vld [vmem:[#allocation6 + $0x68] sm:$0xff] }
 0x179   :  { %2603 = vmatpush.bf16.msrb.mxu3 %v4170_v63  ;;  %2577 = vmatpush.bf16.msrb.mxu1 %v3882_v26  ;;  %v2314_v56 = vpop.f32.mrf.mxu2  ;;  %v2328_v57 = vpop.f32.mrf.mxu3  ;;  %v2219_v48 = vadd.f32 %v4953_v34, %v2205_v52  ;;  %v2287_v63 = vadd.f32 %v2286_v16, %v878_v59  ;;  %v4695_v26 = vld [vmem:[#allocation6 + $0x58] sm:$0xff] }
 0x17a   :  { %v4703_v52 = vld [vmem:[#allocation6 + $0x98] sm:$0xff] }
 0x17b   :  { %v2233_v3 = vadd.f32 %v4955_v41, %v2219_v48  ;;  %v2301_v7 = vadd.f32 %v2300_v39, %v2287_v63  ;;  %v879_v63 = vperm.slane %v4966_v15, 2 }
 0x17c   :  { %2590 = vmatpush.bf16.msrb.mxu2 %v4026_v12  ;;  %2564 = vmatpush.bf16.msrb.mxu0 %v3738_v21  ;;  %v2342_v8 = vpop.f32.mrf.mxu0  ;;  %v4686_v12 = vld [vmem:[#allocation6 + $0x10] sm:$0xff] }
 0x17d   :  { %2604 = vmatpush.bf16.msrb.mxu3 %v4154_v17  ;;  %2578 = vmatpush.bf16.msrb.mxu1 %v3866_v25  ;;  %v2247_v34 = vadd.f32 %v4957_v58, %v2233_v3  ;;  %v2315_v10 = vadd.f32 %v2314_v56, %v2301_v7  ;;  %v4693_v58 = vld [vmem:[#allocation6 + $0x48] sm:$0xff] }
 0x17f   :  { %2565 = vmatmul.bf16.vlgmr.msrb.gmra.mxu0 %v4903_v23  ;;  %v2203_v23 = vadd.f32 %v4939_v53, %v2189_v51  ;;  %v4687_v53 = vld [vmem:[#allocation6 + $0x18] sm:$0xff]  ;;  %v2261_v31 = vadd.f32 %v2260_v36, %v2247_v34  ;;  %v2329_v16 = vadd.f32 %v2328_v57, %v2315_v10  ;;  %v2356_v18 = vpop.f32.mrf.mxu1  ;;  %v4704_v51 = vld [vmem:[#allocation6 + $0xa0] sm:$0xff] }
 0x180   :  { %2885 = vmatpush.bf16.msra.mxu0 %v4691_v2  ;;  %2591 = vmatpush.bf16.msrb.mxu2 %v4010_v29  ;;  %v4684_v29 = vld [vmem:[#allocation6] sm:$0xff] }
 0x181   :  { %2899 = vmatpush.bf16.msra.mxu1 %v4699_v54  ;;  %2605 = vmatpush.bf16.msrb.mxu3 %v4138_v32  ;;  %v2217_v1 = vadd.f32 %v4942_v61, %v2203_v23  ;;  %v2330_v11 = vpop.f32.mrf.mxu3  ;;  %v2275_v21 = vadd.f32 %v2274_v40, %v2261_v31  ;;  %v2343_v24 = vadd.f32 %v2342_v8, %v2329_v16  ;;  %v4701_v23 = vld [vmem:[#allocation6 + $0x88] sm:$0xff]  ;;  %v4700_v57 = vld [vmem:[#allocation6 + $0x80] sm:$0xff] }
 0x182   :  { %2579 = vmatmul.bf16.vlgmr.msrb.gmra.mxu1 %v4905_v27  ;;  %v4688_v27 = vld [vmem:[#allocation6 + $0x20] sm:$0xff] }
 0x183   :  { %v2231_v5 = vadd.f32 %v4945_v13, %v2217_v1  ;;  %v2617_v54 = vmax.f32 %v2275_v21, 0.0  ;;  %v2357_v33 = vadd.f32 %v2356_v18, %v2343_v24  ;;  %v4715_v21 = vld [vmem:[#allocation6 + $0xf8] sm:$0xff] }
 0x184   :  { %2886 = vmatpush.bf16.msra.mxu0 %v4690_v43  ;;  %2592 = vmatpush.bf16.msrb.mxu2 %v3994_v45  ;;  %v2344_v2 = vpop.f32.mrf.mxu0 }
 0x185   :  { %2900 = vmatpush.bf16.msra.mxu1 %v4698_v46  ;;  %2606 = vmatpush.bf16.msrb.mxu3 %v4122_v47  ;;  %v2245_v61 = vadd.f32 %v4949_v19, %v2231_v5 }
 0x187   :  { %2593 = vmatmul.bf16.vlgmr.msrb.gmra.mxu2 %v4909_v62  ;;  %v2289_v62 = vadd.f32 %v2288_v49, %v878_v59  ;;  %v2259_v13 = vadd.f32 %v4959_v4, %v2245_v61  ;;  %v4692_v4 = vld [vmem:[#allocation6 + $0x40] sm:$0xff]  ;;  %v2358_v37 = vpop.f32.mrf.mxu1 }
 0x188   :  { %2887 = vmatpush.bf16.msra.mxu0 %v4689_v50  ;;  %2607 = vmatmul.bf16.vlgmr.msrb.gmra.mxu3 %v4911_v0  ;;  %v2316_v0 = vpop.f32.mrf.mxu2  ;;  %v4705_v50 = vld [vmem:[#allocation6 + $0xa8] sm:$0xff] }
 0x189   :  { %2901 = vmatpush.bf16.msra.mxu1 %v4697_v55  ;;  %v2303_v41 = vadd.f32 %v2302_v30, %v2289_v62  ;;  %v2273_v22 = vadd.f32 %v4961_v9, %v2259_v13  ;;  %v4707_v9 = vld [vmem:[#allocation6 + $0xb8] sm:$0xff]  ;;  %v4702_v55 = vld [vmem:[#allocation6 + $0x90] sm:$0xff]  ;;  %2927 = vmatpush.bf16.msra.mxu3 %v4715_v21 }
 0x18a   :  { %2913 = vmatpush.bf16.msra.mxu2 %v4707_v9 }
 0x18b   :  { %v2317_v17 = vadd.f32 %v2316_v0, %v2303_v41  ;;  %v2613_v32 = vmax.f32 %v2273_v22, 0.0 }
 0x18c   :  { %2888 = vmatpush.bf16.msra.mxu0 %v4688_v27 }
 0x18d   :  { %2902 = vmatpush.bf16.msra.mxu1 %v4696_v6  ;;  %v2331_v25 = vadd.f32 %v2330_v11, %v2317_v17  ;;  %v2384_v28 = vpop.f32.mrf.mxu3  ;;  %v2621_v35 = vpack.c.bf16 %v2617_v54, %v2613_v32  ;;  %v4713_v54 = vld [vmem:[#allocation6 + $0xe8] sm:$0xff]  ;;  %v4711_v32 = vld [vmem:[#allocation6 + $0xd8] sm:$0xff] }
 0x18e   :  { %2914 = vmatpush.bf16.msra.mxu2 %v4706_v42 }
 0x18f   :  { %v2345_v60 = vadd.f32 %v2344_v2, %v2331_v25 }
 0x190   :  { %2889 = vmatpush.bf16.msra.mxu0 %v4687_v53  ;;  %v2370_v19 = vpop.f32.mrf.mxu2 }
 0x191   :  { %2903 = vmatpush.bf16.msra.mxu1 %v4695_v26  ;;  %v2371_v36 = vadd.f32 %v2370_v19, %v2357_v33  ;;  %v2359_v38 = vadd.f32 %v2358_v37, %v2345_v60  ;;  %v4710_v60 = vld [vmem:[#allocation6 + $0xd0] sm:$0xff]  ;;  %v4708_v37 = vld [vmem:[#allocation6 + $0xc0] sm:$0xff] }
 0x192   :  { %2915 = vmatpush.bf16.msra.mxu2 %v4705_v50 }
 0x193   :  { %v2385_v40 = vadd.f32 %v2384_v28, %v2371_v36 }
 0x194   :  { %2890 = vmatpush.bf16.msra.mxu0 %v4686_v12 }
 0x195   :  { %2904 = vmatpush.bf16.msra.mxu1 %v4694_v14  ;;  %v2386_v44 = vpop.f32.mrf.mxu3  ;;  %v2614_v46 = vmax.f32 %v2385_v40, 0.0 }
 0x196   :  { %2916 = vmatpush.bf16.msra.mxu2 %v4704_v51 }
 0x198   :  { %2891 = vmatpush.bf16.msra.mxu0 %v4685_v20  ;;  %v2372_v39 = vpop.f32.mrf.mxu2 }
 0x199   :  { %2905 = vmatpush.bf16.msra.mxu1 %v4693_v58  ;;  %v2373_v43 = vadd.f32 %v2372_v39, %v2359_v38  ;;  %v880_v39 = vperm.slane %v4966_v15, 3 }
 0x19a   :  { %2917 = vmatpush.bf16.msra.mxu2 %v4703_v52 }
 0x19b   :  { %v2387_v45 = vadd.f32 %v2386_v44, %v2373_v43 }
 0x19c   :  { %2892 = vmatpush.bf16.msra.mxu0 %v4684_v29  ;;  %v2398_v59 = vpop.f32.mrf.mxu0  ;;  %v4714_v29 = vld [vmem:[#allocation6 + $0xf0] sm:$0xff] }
 0x19d   :  { %2906 = vmatpush.bf16.msra.mxu1 %v4692_v4  ;;  %v2618_v47 = vmax.f32 %v2387_v45, 0.0  ;;  %v2399_v30 = vadd.f32 %v2398_v59, %v879_v63  ;;  %2928 = vmatpush.bf16.msra.mxu3 %v4714_v29  ;;  %v4712_v4 = vld [vmem:[#allocation6 + $0xe0] sm:$0xff] }
 0x19e   :  { %2918 = vmatpush.bf16.msra.mxu2 %v4702_v55 }
 0x19f   :  { %2893 = vmatmul.bf16.vlgmr.msra.gmra.mxu0 %v2621_v35  ;;  %v2622_v49 = vpack.c.bf16 %v2618_v47, %v2614_v46  ;;  %v2412_v56 = vpop.f32.mrf.mxu1  ;;  %v4709_v35 = vld [vmem:[#allocation6 + $0xc8] sm:$0xff] }
 0x1a0   :  { %v2413_v53 = vadd.f32 %v2412_v56, %v2399_v30 }
 0x1a1   :  { %2907 = vmatmul.bf16.vlgmr.msra.gmra.mxu1 %v2622_v49  ;;  %2929 = vmatpush.bf16.msra.mxu3 %v4713_v54 }
 0x1a2   :  { %2919 = vmatpush.bf16.msra.mxu2 %v4701_v23 }
 0x1a4   :  { %v2400_v27 = vpop.f32.mrf.mxu0 }
 0x1a5   :  { %v2401_v5 = vadd.f32 %v2400_v27, %v879_v63  ;;  %2930 = vmatpush.bf16.msra.mxu3 %v4712_v4 }
 0x1a6   :  { %2920 = vmatpush.bf16.msra.mxu2 %v4700_v57 }
 0x1a7   :  { %v2414_v1 = vpop.f32.mrf.mxu1 }
 0x1a8   :  { %v2415_v26 = vadd.f32 %v2414_v1, %v2401_v5 }
 0x1a9   :  { %2931 = vmatpush.bf16.msra.mxu3 %v4711_v32 }
 0x1aa   :  { %v2426_v48 = vpop.f32.mrf.mxu2 }
 0x1ab   :  { %v2427_v62 = vadd.f32 %v2426_v48, %v2413_v53 }
 0x1ad   :  { %v2440_v6 = vpop.f32.mrf.mxu3  ;;  %2932 = vmatpush.bf16.msra.mxu3 %v4710_v60 }
 0x1ae   :  { %v2441_v10 = vadd.f32 %v2440_v6, %v2427_v62 }
 0x1b1   :  { %2933 = vmatpush.bf16.msra.mxu3 %v4709_v35 }
 0x1b2   :  { %v2428_v7 = vpop.f32.mrf.mxu2 }
 0x1b3   :  { %v2429_v0 = vadd.f32 %v2428_v7, %v2415_v26 }
 0x1b5   :  { %v2442_v8 = vpop.f32.mrf.mxu3  ;;  %2934 = vmatpush.bf16.msra.mxu3 %v4708_v37 }
 0x1b6   :  { %v2443_v31 = vadd.f32 %v2442_v8, %v2429_v0 }
 0x1bc   :  { %v2454_v3 = vpop.f32.mrf.mxu0 }
 0x1bd   :  { %v2455_v11 = vadd.f32 %v2454_v3, %v2441_v10 }
 0x1bf   :  { %v2468_v34 = vpop.f32.mrf.mxu1 }
 0x1c0   :  { %v2469_v14 = vadd.f32 %v2468_v34, %v2455_v11 }
 0x1c4   :  { %v2456_v12 = vpop.f32.mrf.mxu0 }
 0x1c5   :  { %v2457_v13 = vadd.f32 %v2456_v12, %v2443_v31  ;;  %v4730_v12 = vld [vmem:[%s5002_s6] ss:$0 sm:$0xff] }
 0x1c7   :  { %v2470_v17 = vpop.f32.mrf.mxu1 }
 0x1c8   :  { %v2471_v18 = vadd.f32 %v2470_v17, %v2457_v13 }
 0x1ca   :  { %v2482_v61 = vpop.f32.mrf.mxu2 }
 0x1cb   :  { %v2483_v16 = vadd.f32 %v2482_v61, %v2469_v14 }
 0x1cd   :  { %v2496_v41 = vpop.f32.mrf.mxu3 }
 0x1ce   :  { %v2497_v58 = vadd.f32 %v2496_v41, %v2483_v16 }
 0x1d0   :  { %v2615_v2 = vmax.f32 %v2497_v58, 0.0 }
 0x1d2   :  { %v2484_v20 = vpop.f32.mrf.mxu2 }
 0x1d3   :  { %v2485_v22 = vadd.f32 %v2484_v20, %v2471_v18 }
 0x1d5   :  { %v2498_v24 = vpop.f32.mrf.mxu3 }
 0x1d6   :  { %v2499_v25 = vadd.f32 %v2498_v24, %v2485_v22 }
 0x1d8   :  { %v2619_v19 = vmax.f32 %v2499_v25, 0.0 }
 0x1da   :  { %v2623_v28 = vpack.c.bf16 %v2619_v19, %v2615_v2 }
 0x1dc   :  { %2921 = vmatmul.bf16.vlgmr.msra.gmra.mxu2 %v2623_v28  ;;  %v2510_v33 = vpop.f32.mrf.mxu0 }
 0x1dd   :  { %v2511_v43 = vadd.f32 %v2510_v33, %v880_v39 }
 0x1df   :  { %v2524_v36 = vpop.f32.mrf.mxu1 }
 0x1e0   :  { %v2525_v46 = vadd.f32 %v2524_v36, %v2511_v43 }
 0x1e4   :  { %v2512_v38 = vpop.f32.mrf.mxu0 }
 0x1e5   :  { %v2513_v47 = vadd.f32 %v2512_v38, %v880_v39 }
 0x1e7   :  { %v2526_v44 = vpop.f32.mrf.mxu1 }
 0x1e8   :  { %v2527_v51 = vadd.f32 %v2526_v44, %v2513_v47 }
 0x1ea   :  { %v2538_v9 = vpop.f32.mrf.mxu2 }
 0x1eb   :  { %v2539_v49 = vadd.f32 %v2538_v9, %v2525_v46 }
 0x1ed   :  { %v2552_v40 = vpop.f32.mrf.mxu3 }
 0x1ee   :  { %v2553_v59 = vadd.f32 %v2552_v40, %v2539_v49 }
 0x1f2   :  { %v2540_v42 = vpop.f32.mrf.mxu2 }
 0x1f3   :  { %v2541_v55 = vadd.f32 %v2540_v42, %v2527_v51 }
 0x1f5   :  { %v2554_v50 = vpop.f32.mrf.mxu3 }
 0x1f6   :  { %v2555_v27 = vadd.f32 %v2554_v50, %v2541_v55 }
 0x1fc   :  { %v2566_v45 = vpop.f32.mrf.mxu0 }
 0x1fd   :  { %v2567_v23 = vadd.f32 %v2566_v45, %v2553_v59 }
 0x1ff   :  { %v2580_v52 = vpop.f32.mrf.mxu1 }
 0x200   :  { %v2581_v15 = vadd.f32 %v2580_v52, %v2567_v23 }
 0x204   :  { %v2568_v56 = vpop.f32.mrf.mxu0 }
 0x205   :  { %v2569_v63 = vadd.f32 %v2568_v56, %v2555_v27 }
 0x207   :  { %v2582_v30 = vpop.f32.mrf.mxu1 }
 0x208   :  { %v2583_v1 = vadd.f32 %v2582_v30, %v2569_v63 }
 0x20a   :  { %v2594_v57 = vpop.f32.mrf.mxu2 }
 0x20b   :  { %v2608_v48 = vpop.f32.mrf.mxu3  ;;  %v2595_v6 = vadd.f32 %v2594_v57, %v2581_v15 }
 0x20d   :  { %v2609_v53 = vadd.f32 %v2608_v48, %v2595_v6 }
 0x20f   :  { %v2616_v8 = vmax.f32 %v2609_v53, 0.0 }
 0x212   :  { %v2596_v3 = vpop.f32.mrf.mxu2 }
 0x213   :  { %v2597_v5 = vadd.f32 %v2596_v3, %v2583_v1  ;;  %v2610_v7 = vpop.f32.mrf.mxu3 }
 0x215   :  { %v2611_v62 = vadd.f32 %v2610_v7, %v2597_v5 }
 0x217   :  { %v2620_v26 = vmax.f32 %v2611_v62, 0.0 }
 0x219   :  { %v2624_v34 = vpack.c.bf16 %v2620_v26, %v2616_v8 }
 0x21b   :  { %2935 = vmatmul.bf16.vlgmr.msra.gmra.mxu3 %v2624_v34 }
 0x21c   :  { %v2894_v10 = vpop.f32.mrf.mxu0 }
 0x21d   :  { %v2895_v14 = vadd.f32 %v4730_v12, %v2894_v10 }
 0x21e   :  { %v2908_v0 = vpop.f32.mrf.mxu1 }
 0x21f   :  { %v2909_v17 = vadd.f32 %v2908_v0, %v2895_v14 }
 0x224   :  { %v2896_v61 = vpop.f32.mrf.mxu0 }
 0x225   :  { %v2897_v13 = vadd.f32 %v4730_v12, %v2896_v61 }
 0x226   :  { %v2910_v41 = vpop.f32.mrf.mxu1 }
 0x227   :  { %v2911_v18 = vadd.f32 %v2910_v41, %v2897_v13 }
 0x25f   :  { %v2922_v11 = vpop.f32.mrf.mxu2 }
 0x260   :  { %v2923_v20 = vadd.f32 %v2922_v11, %v2909_v17 }
 0x267   :  { %v2924_v16 = vpop.f32.mrf.mxu2 }
 0x268   :  { %v2925_v21 = vadd.f32 %v2924_v16, %v2911_v18 }
 0x29e   :  { %v2936_v31 = vpop.f32.mrf.mxu3 }
 0x29f   :  { %v2937_v22 = vadd.f32 %v2936_v31, %v2923_v20 }
 0x2a6   :  { %v2938_v58 = vpop.f32.mrf.mxu3 }
 0x2a7   :  { %v2939_v24 = vadd.f32 %v2938_v58, %v2925_v21 }
 0x2a9   :  { %v4719_v25 = vpack.c.bf16 %v2939_v24, %v2937_v22 }
 0x2ab   :  { %4720 = vst [vmem:[%s5003_s7] sm:$0xff] %v4719_v25  }
 0x2ac   :  { %2949 = vsyncpa [#allocation3], 1 }
 0x2ad   :  { %2950 = vsyncpa [#allocation5], 1 }

</bundles_post_ra>
